<compile_context>
chip_gen: v7x
topology: tpu7x:2x2x1
jax: 0.10.0
libtpu: 0.0.40
codegen_flags: <defaults>
</compile_context>

<pallas_src>
import jax
import jax.numpy as jnp
from jax import lax
from jax.experimental import pallas as pl
from jax.experimental.pallas import tpu as pltpu

BN_EPS = 1e-5


# ---------------------------------------------------------------------------
# Kernel helpers (operate on lane-folded values: rows = N*H, lanes = W*C).
# ---------------------------------------------------------------------------
def _shift_rows_down(x):
    """result[r] = x[r-1]; row 0 -> 0 (caller masks image boundaries)."""
    zero = jnp.zeros((1, x.shape[1]), x.dtype)
    return jnp.concatenate([zero, x[:-1, :]], axis=0)


def _shift_rows_up(x):
    """result[r] = x[r+1]; last row -> 0 (caller masks image boundaries)."""
    zero = jnp.zeros((1, x.shape[1]), x.dtype)
    return jnp.concatenate([x[1:, :], zero], axis=0)


def _conv3x3_rows(x2d, wband_ref, m_top, m_bot):
    """'Same' 3x3 convolution on lane-folded activations.

    x2d:        (N*H, W*Cin)  rows = (n, h), lanes = (w, cin).
    wband_ref:  (3, W*Cin, W*Cout) ref; wband_ref[dy] applies every (dx, cin)
                tap of kernel row dy (width zero-padding folded into the band).
    m_top/m_bot:(N*H, 1) masks zeroing rows whose dy=-1 / dy=+1 neighbour is
                outside the image (height zero-padding).
    Returns (N*H, W*Cout) f32.
    """
    x_dn = _shift_rows_down(x2d) * m_top   # neighbour row h-1  (dy = 0)
    x_up = _shift_rows_up(x2d) * m_bot     # neighbour row h+1  (dy = 2)
    acc = jnp.dot(x_dn, wband_ref[0], preferred_element_type=jnp.float32)
    acc = acc + jnp.dot(x2d, wband_ref[1], preferred_element_type=jnp.float32)
    acc = acc + jnp.dot(x_up, wband_ref[2], preferred_element_type=jnp.float32)
    return acc


def _bias_relu_bn(y, b_row, g_ch, be_ch, gsum, gexp, inv_m):
    """bias + ReLU + training-mode BatchNorm2d on lane-folded activations.

    y:      (N*H, W*C) conv output.
    b_row:  (1, W*C)   bias tiled across w.
    g_ch / be_ch: (1, C) BN affine params.
    gsum:   (W*C, C)   lane -> channel reduction matrix (sum over w).
    gexp:   (C, W*C)   channel -> lane broadcast matrix.
    inv_m:  1 / (N*H*W) (static python float).
    """
    y = jnp.maximum(y + b_row, 0.0)
    # One-pass statistics: sum and sum-of-squares in the same traversal.
    s1 = jnp.sum(y, axis=0, keepdims=True)          # (1, W*C)
    s2 = jnp.sum(y * y, axis=0, keepdims=True)      # (1, W*C)
    mean = jnp.dot(s1, gsum, preferred_element_type=jnp.float32) * inv_m  # (1, C)
    ex2 = jnp.dot(s2, gsum, preferred_element_type=jnp.float32) * inv_m   # (1, C)
    var = ex2 - mean * mean                          # biased variance
    scale_c = g_ch * lax.rsqrt(var + BN_EPS)         # (1, C)
    shift_c = be_ch - mean * scale_c                 # (1, C)
    scale = jnp.dot(scale_c, gexp, preferred_element_type=jnp.float32)    # (1, W*C)
    shift = jnp.dot(shift_c, gexp, preferred_element_type=jnp.float32)    # (1, W*C)
    return y * scale + shift


def unet_conv_block_kernel(x_ref, mtop_ref, mbot_ref,
                           w1_ref, b1_ref, g1_ref, be1_ref,
                           w2_ref, b2_ref, g2_ref, be2_ref,
                           gsum_ref, gexp_ref, out_ref):
    rows = x_ref.shape[0]                     # N*H
    cout = g1_ref.shape[1]
    width = out_ref.shape[1] // cout          # W
    inv_m = 1.0 / float(rows * width)         # 1 / (N*H*W)

    m_top = mtop_ref[...]
    m_bot = mbot_ref[...]
    gsum = gsum_ref[...]
    gexp = gexp_ref[...]

    # conv1 -> ReLU -> BN1
    y = _conv3x3_rows(x_ref[...], w1_ref, m_top, m_bot)
    y = _bias_relu_bn(y, b1_ref[...], g1_ref[...], be1_ref[...], gsum, gexp, inv_m)
    # conv2 -> ReLU -> BN2 (intermediate stays in values; no VMEM scratch)
    y = _conv3x3_rows(y, w2_ref, m_top, m_bot)
    y = _bias_relu_bn(y, b2_ref[...], g2_ref[...], be2_ref[...], gsum, gexp, inv_m)

    out_ref[...] = y          # (N*H, W*Cout): unmasked, fully lane-dense store


# ---------------------------------------------------------------------------
# Wrapper-side layout plumbing.
# ---------------------------------------------------------------------------
def _band_weights(w_oihw, width):
    """OIHW (Co, Ci, 3, 3) -> (3, W*Ci, W*Co) banded per-dy matrices.

    band[dy, w_in*Ci + ci, w_out*Co + co] = w[co, ci, dy, w_in - w_out + 1]
    whenever that dx offset lies in [0, 3); width zero-padding drops out of
    the band structure automatically.
    """
    w_hwio = jnp.transpose(w_oihw, (2, 3, 1, 0)).astype(jnp.float32)  # (3,3,Ci,Co)
    kh, kw, ci, co = w_hwio.shape
    bands = []
    for dy in range(kh):
        m = jnp.zeros((width, ci, width, co), jnp.float32)
        for dx in range(kw):
            eye = jnp.eye(width, width, k=1 - dx, dtype=jnp.float32)  # [w_in, w_out]
            m = m + jnp.einsum('vw,io->viwo', eye, w_hwio[dy, dx])
        bands.append(m.reshape(width * ci, width * co))
    return jnp.stack(bands, axis=0)


@jax.jit
def unet_conv_block(x_nchw, w1, b1, g1, be1, w2, b2, g2, be2):
    """x_nchw: (N, Cin, H, W).  w1: (Cout, Cin, 3, 3), w2: (Cout, Cout, 3, 3)
    (PyTorch OIHW).  Returns (N, Cout, H, W)."""
    n, cin, h, w = x_nchw.shape
    cout = w1.shape[0]
    f32 = jnp.float32

    # NCHW -> lane-folded (N*H, W*Cin): rows = (n, h), lanes = (w, cin).
    x2d = jnp.transpose(x_nchw, (0, 2, 3, 1)).astype(f32).reshape(n * h, w * cin)

    w1b = _band_weights(w1, w)                 # (3, W*Cin,  W*Cout)
    w2b = _band_weights(w2, w)                 # (3, W*Cout, W*Cout)

    # Height-boundary masks for the dy = -1 / +1 row shifts.
    h_idx = jnp.arange(n * h) % h
    m_top = (h_idx != 0).astype(f32)[:, None]          # (N*H, 1)
    m_bot = (h_idx != h - 1).astype(f32)[:, None]      # (N*H, 1)

    # Lane <-> channel reduce / broadcast matrices for BN statistics.
    gsum = jnp.tile(jnp.eye(cout, dtype=f32), (w, 1))  # (W*Cout, Cout)
    gexp = jnp.tile(jnp.eye(cout, dtype=f32), (1, w))  # (Cout, W*Cout)

    row = lambda v: v.reshape(1, -1).astype(f32)
    b1t = jnp.tile(b1.astype(f32), w).reshape(1, w * cout)
    b2t = jnp.tile(b2.astype(f32), w).reshape(1, w * cout)

    vmem = pl.BlockSpec(memory_space=pltpu.MemorySpace.VMEM)
    out2d = pl.pallas_call(
        unet_conv_block_kernel,
        out_shape=jax.ShapeDtypeStruct((n * h, w * cout), f32),
        in_specs=[vmem] * 13,
        out_specs=vmem,
    )(x2d, m_top, m_bot,
      w1b, b1t, row(g1), row(be1),
      w2b, b2t, row(g2), row(be2),
      gsum, gexp)

    # (N*H, W*Cout) -> NCHW (free reshape/transpose at the XLA level).
    return jnp.transpose(out2d.reshape(n, h, w, cout), (0, 3, 1, 2))


# ---------------------------------------------------------------------------
# Pure-JAX reference replicating the PyTorch forward (training-mode BN).
# ---------------------------------------------------------------------------
def _reference(x_nchw, w1, b1, g1, be1, w2, b2, g2, be2):
    def conv(x, w, b):
        y = lax.conv_general_dilated(
            x, w, window_strides=(1, 1), padding=((1, 1), (1, 1)),
            dimension_numbers=("NCHW", "OIHW", "NCHW"))
        return y + b[None, :, None, None]

    def bn(x, g, be):
        mean = jnp.mean(x, axis=(0, 2, 3), keepdims=True)
        var = jnp.mean((x - mean) ** 2, axis=(0, 2, 3), keepdims=True)
        return (g[None, :, None, None] * (x - mean) * lax.rsqrt(var + BN_EPS)
                + be[None, :, None, None])

    y = bn(jnp.maximum(conv(x_nchw, w1, b1), 0.0), g1, be1)
    y = bn(jnp.maximum(conv(y, w2, b2), 0.0), g2, be2)
    return y


if __name__ == "__main__":
    N, Cin, Cout, H, W = 2, 4, 8, 16, 16

    key = jax.random.PRNGKey(0)
    ks = jax.random.split(key, 8)
    x = jax.random.normal(ks[0], (N, Cin, H, W), jnp.float32)

    # Deterministic synthetic parameters (shapes match nn.Conv2d / BatchNorm2d).
    w1 = jax.random.normal(ks[1], (Cout, Cin, 3, 3), jnp.float32) * 0.2
    b1 = jax.random.normal(ks[2], (Cout,), jnp.float32) * 0.1
    w2 = jax.random.normal(ks[3], (Cout, Cout, 3, 3), jnp.float32) * 0.2
    b2 = jax.random.normal(ks[4], (Cout,), jnp.float32) * 0.1
    g1 = 1.0 + 0.1 * jax.random.normal(ks[5], (Cout,), jnp.float32)
    be1 = 0.1 * jax.random.normal(ks[6], (Cout,), jnp.float32)
    g2 = jnp.ones((Cout,), jnp.float32)
    be2 = jnp.zeros((Cout,), jnp.float32)

    out = unet_conv_block(x, w1, b1, g1, be1, w2, b2, g2, be2)
    out = jax.block_until_ready(out)

    ref = _reference(x, w1, b1, g1, be1, w2, b2, g2, be2)
    assert out.shape == (N, Cout, H, W), out.shape
    err = float(jnp.max(jnp.abs(out - ref)))
    assert jnp.allclose(out, ref, atol=2e-3, rtol=2e-3), err

    print("KERNEL_OK")
</pallas_src>

<mosaic_0001>
module attributes {stable_mosaic.version = 11 : i64} {
  func.func @unet_conv_block_kernel(%arg0: memref<32x64xf32, #tpu.memory_space<vmem>>, %arg1: memref<32x1xf32, #tpu.memory_space<vmem>>, %arg2: memref<32x1xf32, #tpu.memory_space<vmem>>, %arg3: memref<3x64x128xf32, #tpu.memory_space<vmem>>, %arg4: memref<1x128xf32, #tpu.memory_space<vmem>>, %arg5: memref<1x8xf32, #tpu.memory_space<vmem>>, %arg6: memref<1x8xf32, #tpu.memory_space<vmem>>, %arg7: memref<3x128x128xf32, #tpu.memory_space<vmem>>, %arg8: memref<1x128xf32, #tpu.memory_space<vmem>>, %arg9: memref<1x8xf32, #tpu.memory_space<vmem>>, %arg10: memref<1x8xf32, #tpu.memory_space<vmem>>, %arg11: memref<128x8xf32, #tpu.memory_space<vmem>>, %arg12: memref<8x128xf32, #tpu.memory_space<vmem>>, %arg13: memref<32x128xf32, #tpu.memory_space<vmem>>) attributes {dimension_semantics = [], scalar_prefetch = 0 : i64, scratch_operands = 0 : i64, tpu.core_type = #tpu.core_type<tc>} {
    %c0 = arith.constant 0 : index
    %c0_0 = arith.constant 0 : index
    %0 = vector.load %arg1[%c0, %c0_0] : memref<32x1xf32, #tpu.memory_space<vmem>>, vector<32x1xf32>
    %c0_1 = arith.constant 0 : index
    %c0_2 = arith.constant 0 : index
    %1 = vector.load %arg2[%c0_1, %c0_2] : memref<32x1xf32, #tpu.memory_space<vmem>>, vector<32x1xf32>
    %c0_3 = arith.constant 0 : index
    %c0_4 = arith.constant 0 : index
    %2 = vector.load %arg11[%c0_3, %c0_4] : memref<128x8xf32, #tpu.memory_space<vmem>>, vector<128x8xf32>
    %c0_5 = arith.constant 0 : index
    %c0_6 = arith.constant 0 : index
    %3 = vector.load %arg12[%c0_5, %c0_6] : memref<8x128xf32, #tpu.memory_space<vmem>>, vector<8x128xf32>
    %c0_7 = arith.constant 0 : index
    %c0_8 = arith.constant 0 : index
    %4 = vector.load %arg0[%c0_7, %c0_8] : memref<32x64xf32, #tpu.memory_space<vmem>>, vector<32x64xf32>
    %cst = arith.constant 0.000000e+00 : f32
    %5 = vector.broadcast %cst : f32 to vector<1x64xf32>
    %6 = vector.extract_strided_slice %4 {offsets = [0, 0], sizes = [31, 64], strides = [1, 1]} : vector<32x64xf32> to vector<31x64xf32>
    %7 = tpu.concatenate %5, %6 in 0 : vector<1x64xf32>, vector<31x64xf32> -> vector<32x64xf32>
    %8 = vector.broadcast %0 : vector<32x1xf32> to vector<32x64xf32>
    %9 = arith.mulf %7, %8 : vector<32x64xf32>
    %cst_9 = arith.constant 0.000000e+00 : f32
    %10 = vector.broadcast %cst_9 : f32 to vector<1x64xf32>
    %11 = vector.extract_strided_slice %4 {offsets = [1, 0], sizes = [31, 64], strides = [1, 1]} : vector<32x64xf32> to vector<31x64xf32>
    %12 = tpu.concatenate %11, %10 in 0 : vector<31x64xf32>, vector<1x64xf32> -> vector<32x64xf32>
    %13 = vector.broadcast %1 : vector<32x1xf32> to vector<32x64xf32>
    %14 = arith.mulf %12, %13 : vector<32x64xf32>
    %c0_10 = arith.constant 0 : index
    %c0_11 = arith.constant 0 : index
    %c0_12 = arith.constant 0 : index
    %15 = vector.load %arg3[%c0_10, %c0_11, %c0_12] : memref<3x64x128xf32, #tpu.memory_space<vmem>>, vector<1x64x128xf32>
    %16 = vector.shape_cast %15 : vector<1x64x128xf32> to vector<64x128xf32>
    %cst_13 = arith.constant dense<0.000000e+00> : vector<32x128xf32>
    %17 = tpu.matmul %9, %16, %cst_13 {dimension_numbers = #tpu.dot_dimension_numbers<[1], [0], [0], [1], [0, 0, 1, 1], [], []>} : vector<32x64xf32>, vector<64x128xf32>, vector<32x128xf32> -> vector<32x128xf32>
    %c1 = arith.constant 1 : index
    %c0_14 = arith.constant 0 : index
    %c0_15 = arith.constant 0 : index
    %18 = vector.load %arg3[%c1, %c0_14, %c0_15] : memref<3x64x128xf32, #tpu.memory_space<vmem>>, vector<1x64x128xf32>
    %19 = vector.shape_cast %18 : vector<1x64x128xf32> to vector<64x128xf32>
    %cst_16 = arith.constant dense<0.000000e+00> : vector<32x128xf32>
    %20 = tpu.matmul %4, %19, %cst_16 {dimension_numbers = #tpu.dot_dimension_numbers<[1], [0], [0], [1], [0, 0, 1, 1], [], []>} : vector<32x64xf32>, vector<64x128xf32>, vector<32x128xf32> -> vector<32x128xf32>
    %21 = arith.addf %17, %20 : vector<32x128xf32>
    %c2 = arith.constant 2 : index
    %c0_17 = arith.constant 0 : index
    %c0_18 = arith.constant 0 : index
    %22 = vector.load %arg3[%c2, %c0_17, %c0_18] : memref<3x64x128xf32, #tpu.memory_space<vmem>>, vector<1x64x128xf32>
    %23 = vector.shape_cast %22 : vector<1x64x128xf32> to vector<64x128xf32>
    %cst_19 = arith.constant dense<0.000000e+00> : vector<32x128xf32>
    %24 = tpu.matmul %14, %23, %cst_19 {dimension_numbers = #tpu.dot_dimension_numbers<[1], [0], [0], [1], [0, 0, 1, 1], [], []>} : vector<32x64xf32>, vector<64x128xf32>, vector<32x128xf32> -> vector<32x128xf32>
    %25 = arith.addf %21, %24 : vector<32x128xf32>
    %c0_20 = arith.constant 0 : index
    %c0_21 = arith.constant 0 : index
    %26 = vector.load %arg4[%c0_20, %c0_21] : memref<1x128xf32, #tpu.memory_space<vmem>>, vector<1x128xf32>
    %c0_22 = arith.constant 0 : index
    %c0_23 = arith.constant 0 : index
    %27 = vector.load %arg5[%c0_22, %c0_23] : memref<1x8xf32, #tpu.memory_space<vmem>>, vector<1x8xf32>
    %c0_24 = arith.constant 0 : index
    %c0_25 = arith.constant 0 : index
    %28 = vector.load %arg6[%c0_24, %c0_25] : memref<1x8xf32, #tpu.memory_space<vmem>>, vector<1x8xf32>
    %29 = vector.broadcast %26 : vector<1x128xf32> to vector<32x128xf32>
    %30 = arith.addf %25, %29 : vector<32x128xf32>
    %cst_26 = arith.constant 0.000000e+00 : f32
    %31 = vector.broadcast %cst_26 : f32 to vector<32x128xf32>
    %32 = arith.maximumf %30, %31 : vector<32x128xf32>
    %cst_27 = arith.constant dense<0.000000e+00> : vector<128xf32>
    %33 = vector.multi_reduction <add>, %32, %cst_27 [0] : vector<32x128xf32> to vector<128xf32>
    %34 = vector.shape_cast %33 : vector<128xf32> to vector<1x128xf32>
    %35 = arith.mulf %32, %32 : vector<32x128xf32>
    %cst_28 = arith.constant dense<0.000000e+00> : vector<128xf32>
    %36 = vector.multi_reduction <add>, %35, %cst_28 [0] : vector<32x128xf32> to vector<128xf32>
    %37 = vector.shape_cast %36 : vector<128xf32> to vector<1x128xf32>
    %cst_29 = arith.constant dense<0.000000e+00> : vector<1x8xf32>
    %38 = tpu.matmul %34, %2, %cst_29 {dimension_numbers = #tpu.dot_dimension_numbers<[1], [0], [0], [1], [0, 0, 1, 1], [], []>} : vector<1x128xf32>, vector<128x8xf32>, vector<1x8xf32> -> vector<1x8xf32>
    %cst_30 = arith.constant 0.001953125 : f32
    %39 = vector.broadcast %cst_30 : f32 to vector<1x8xf32>
    %40 = arith.mulf %38, %39 : vector<1x8xf32>
    %cst_31 = arith.constant dense<0.000000e+00> : vector<1x8xf32>
    %41 = tpu.matmul %37, %2, %cst_31 {dimension_numbers = #tpu.dot_dimension_numbers<[1], [0], [0], [1], [0, 0, 1, 1], [], []>} : vector<1x128xf32>, vector<128x8xf32>, vector<1x8xf32> -> vector<1x8xf32>
    %cst_32 = arith.constant 0.001953125 : f32
    %42 = vector.broadcast %cst_32 : f32 to vector<1x8xf32>
    %43 = arith.mulf %41, %42 : vector<1x8xf32>
    %44 = arith.mulf %40, %40 : vector<1x8xf32>
    %45 = arith.subf %43, %44 : vector<1x8xf32>
    %cst_33 = arith.constant 9.99999974E-6 : f32
    %46 = vector.broadcast %cst_33 : f32 to vector<1x8xf32>
    %47 = arith.addf %45, %46 : vector<1x8xf32>
    %48 = math.rsqrt %47 : vector<1x8xf32>
    %49 = arith.mulf %27, %48 : vector<1x8xf32>
    %50 = arith.mulf %40, %49 : vector<1x8xf32>
    %51 = arith.subf %28, %50 : vector<1x8xf32>
    %cst_34 = arith.constant dense<0.000000e+00> : vector<1x128xf32>
    %52 = tpu.matmul %49, %3, %cst_34 {dimension_numbers = #tpu.dot_dimension_numbers<[1], [0], [0], [1], [0, 0, 1, 1], [], []>} : vector<1x8xf32>, vector<8x128xf32>, vector<1x128xf32> -> vector<1x128xf32>
    %cst_35 = arith.constant dense<0.000000e+00> : vector<1x128xf32>
    %53 = tpu.matmul %51, %3, %cst_35 {dimension_numbers = #tpu.dot_dimension_numbers<[1], [0], [0], [1], [0, 0, 1, 1], [], []>} : vector<1x8xf32>, vector<8x128xf32>, vector<1x128xf32> -> vector<1x128xf32>
    %54 = vector.broadcast %52 : vector<1x128xf32> to vector<32x128xf32>
    %55 = arith.mulf %32, %54 : vector<32x128xf32>
    %56 = vector.broadcast %53 : vector<1x128xf32> to vector<32x128xf32>
    %57 = arith.addf %55, %56 : vector<32x128xf32>
    %cst_36 = arith.constant 0.000000e+00 : f32
    %58 = vector.broadcast %cst_36 : f32 to vector<1x128xf32>
    %59 = vector.extract_strided_slice %57 {offsets = [0, 0], sizes = [31, 128], strides = [1, 1]} : vector<32x128xf32> to vector<31x128xf32>
    %60 = tpu.concatenate %58, %59 in 0 : vector<1x128xf32>, vector<31x128xf32> -> vector<32x128xf32>
    %61 = vector.broadcast %0 : vector<32x1xf32> to vector<32x128xf32>
    %62 = arith.mulf %60, %61 : vector<32x128xf32>
    %cst_37 = arith.constant 0.000000e+00 : f32
    %63 = vector.broadcast %cst_37 : f32 to vector<1x128xf32>
    %64 = vector.extract_strided_slice %57 {offsets = [1, 0], sizes = [31, 128], strides = [1, 1]} : vector<32x128xf32> to vector<31x128xf32>
    %65 = tpu.concatenate %64, %63 in 0 : vector<31x128xf32>, vector<1x128xf32> -> vector<32x128xf32>
    %66 = vector.broadcast %1 : vector<32x1xf32> to vector<32x128xf32>
    %67 = arith.mulf %65, %66 : vector<32x128xf32>
    %c0_38 = arith.constant 0 : index
    %c0_39 = arith.constant 0 : index
    %c0_40 = arith.constant 0 : index
    %68 = vector.load %arg7[%c0_38, %c0_39, %c0_40] : memref<3x128x128xf32, #tpu.memory_space<vmem>>, vector<1x128x128xf32>
    %69 = vector.shape_cast %68 : vector<1x128x128xf32> to vector<128x128xf32>
    %cst_41 = arith.constant dense<0.000000e+00> : vector<32x128xf32>
    %70 = tpu.matmul %62, %69, %cst_41 {dimension_numbers = #tpu.dot_dimension_numbers<[1], [0], [0], [1], [0, 0, 1, 1], [], []>} : vector<32x128xf32>, vector<128x128xf32>, vector<32x128xf32> -> vector<32x128xf32>
    %c1_42 = arith.constant 1 : index
    %c0_43 = arith.constant 0 : index
    %c0_44 = arith.constant 0 : index
    %71 = vector.load %arg7[%c1_42, %c0_43, %c0_44] : memref<3x128x128xf32, #tpu.memory_space<vmem>>, vector<1x128x128xf32>
    %72 = vector.shape_cast %71 : vector<1x128x128xf32> to vector<128x128xf32>
    %cst_45 = arith.constant dense<0.000000e+00> : vector<32x128xf32>
    %73 = tpu.matmul %57, %72, %cst_45 {dimension_numbers = #tpu.dot_dimension_numbers<[1], [0], [0], [1], [0, 0, 1, 1], [], []>} : vector<32x128xf32>, vector<128x128xf32>, vector<32x128xf32> -> vector<32x128xf32>
    %74 = arith.addf %70, %73 : vector<32x128xf32>
    %c2_46 = arith.constant 2 : index
    %c0_47 = arith.constant 0 : index
    %c0_48 = arith.constant 0 : index
    %75 = vector.load %arg7[%c2_46, %c0_47, %c0_48] : memref<3x128x128xf32, #tpu.memory_space<vmem>>, vector<1x128x128xf32>
    %76 = vector.shape_cast %75 : vector<1x128x128xf32> to vector<128x128xf32>
    %cst_49 = arith.constant dense<0.000000e+00> : vector<32x128xf32>
    %77 = tpu.matmul %67, %76, %cst_49 {dimension_numbers = #tpu.dot_dimension_numbers<[1], [0], [0], [1], [0, 0, 1, 1], [], []>} : vector<32x128xf32>, vector<128x128xf32>, vector<32x128xf32> -> vector<32x128xf32>
    %78 = arith.addf %74, %77 : vector<32x128xf32>
    %c0_50 = arith.constant 0 : index
    %c0_51 = arith.constant 0 : index
    %79 = vector.load %arg8[%c0_50, %c0_51] : memref<1x128xf32, #tpu.memory_space<vmem>>, vector<1x128xf32>
    %c0_52 = arith.constant 0 : index
    %c0_53 = arith.constant 0 : index
    %80 = vector.load %arg9[%c0_52, %c0_53] : memref<1x8xf32, #tpu.memory_space<vmem>>, vector<1x8xf32>
    %c0_54 = arith.constant 0 : index
    %c0_55 = arith.constant 0 : index
    %81 = vector.load %arg10[%c0_54, %c0_55] : memref<1x8xf32, #tpu.memory_space<vmem>>, vector<1x8xf32>
    %82 = vector.broadcast %79 : vector<1x128xf32> to vector<32x128xf32>
    %83 = arith.addf %78, %82 : vector<32x128xf32>
    %cst_56 = arith.constant 0.000000e+00 : f32
    %84 = vector.broadcast %cst_56 : f32 to vector<32x128xf32>
    %85 = arith.maximumf %83, %84 : vector<32x128xf32>
    %cst_57 = arith.constant dense<0.000000e+00> : vector<128xf32>
    %86 = vector.multi_reduction <add>, %85, %cst_57 [0] : vector<32x128xf32> to vector<128xf32>
    %87 = vector.shape_cast %86 : vector<128xf32> to vector<1x128xf32>
    %88 = arith.mulf %85, %85 : vector<32x128xf32>
    %cst_58 = arith.constant dense<0.000000e+00> : vector<128xf32>
    %89 = vector.multi_reduction <add>, %88, %cst_58 [0] : vector<32x128xf32> to vector<128xf32>
    %90 = vector.shape_cast %89 : vector<128xf32> to vector<1x128xf32>
    %cst_59 = arith.constant dense<0.000000e+00> : vector<1x8xf32>
    %91 = tpu.matmul %87, %2, %cst_59 {dimension_numbers = #tpu.dot_dimension_numbers<[1], [0], [0], [1], [0, 0, 1, 1], [], []>} : vector<1x128xf32>, vector<128x8xf32>, vector<1x8xf32> -> vector<1x8xf32>
    %cst_60 = arith.constant 0.001953125 : f32
    %92 = vector.broadcast %cst_60 : f32 to vector<1x8xf32>
    %93 = arith.mulf %91, %92 : vector<1x8xf32>
    %cst_61 = arith.constant dense<0.000000e+00> : vector<1x8xf32>
    %94 = tpu.matmul %90, %2, %cst_61 {dimension_numbers = #tpu.dot_dimension_numbers<[1], [0], [0], [1], [0, 0, 1, 1], [], []>} : vector<1x128xf32>, vector<128x8xf32>, vector<1x8xf32> -> vector<1x8xf32>
    %cst_62 = arith.constant 0.001953125 : f32
    %95 = vector.broadcast %cst_62 : f32 to vector<1x8xf32>
    %96 = arith.mulf %94, %95 : vector<1x8xf32>
    %97 = arith.mulf %93, %93 : vector<1x8xf32>
    %98 = arith.subf %96, %97 : vector<1x8xf32>
    %cst_63 = arith.constant 9.99999974E-6 : f32
    %99 = vector.broadcast %cst_63 : f32 to vector<1x8xf32>
    %100 = arith.addf %98, %99 : vector<1x8xf32>
    %101 = math.rsqrt %100 : vector<1x8xf32>
    %102 = arith.mulf %80, %101 : vector<1x8xf32>
    %103 = arith.mulf %93, %102 : vector<1x8xf32>
    %104 = arith.subf %81, %103 : vector<1x8xf32>
    %cst_64 = arith.constant dense<0.000000e+00> : vector<1x128xf32>
    %105 = tpu.matmul %102, %3, %cst_64 {dimension_numbers = #tpu.dot_dimension_numbers<[1], [0], [0], [1], [0, 0, 1, 1], [], []>} : vector<1x8xf32>, vector<8x128xf32>, vector<1x128xf32> -> vector<1x128xf32>
    %cst_65 = arith.constant dense<0.000000e+00> : vector<1x128xf32>
    %106 = tpu.matmul %104, %3, %cst_65 {dimension_numbers = #tpu.dot_dimension_numbers<[1], [0], [0], [1], [0, 0, 1, 1], [], []>} : vector<1x8xf32>, vector<8x128xf32>, vector<1x128xf32> -> vector<1x128xf32>
    %107 = vector.broadcast %105 : vector<1x128xf32> to vector<32x128xf32>
    %108 = arith.mulf %85, %107 : vector<32x128xf32>
    %109 = vector.broadcast %106 : vector<1x128xf32> to vector<32x128xf32>
    %110 = arith.addf %108, %109 : vector<32x128xf32>
    %c0_66 = arith.constant 0 : index
    %c0_67 = arith.constant 0 : index
    %111 = vector.load %arg13[%c0_66, %c0_67] : memref<32x128xf32, #tpu.memory_space<vmem>>, vector<32x128xf32>
    tpu.vector_store %arg13[%c0_66, %c0_67], %110 {strides = array<i32>} : memref<32x128xf32, #tpu.memory_space<vmem>>, vector<32x128xf32>,
    return
  }
}

</mosaic_0001>

<bundles_post_ra>
// kernel: tile.29
= control target key start
LH: loop header
LB: loop body
LE: loop exit
PB: predicated region body
PF: predicated region fallthrough
CT: control target
= control target key end

     0   :  { %vm6_vm0 = vcmask 1043458   ;;  %vm10_vm1 = vcmask 1045508   ;;  %vm14_vm2 = vcmask 1047558   ;;  %s19_s6 = smov 3  ;;  %s22_s7 = smov 12  ;;  %vm16_vm3 = vcmask 64512   ;;  %s736_s0 = inlined_call_operand.vmem [shape: f32[8,16,8], index: 0, kind: input, shape index: {}]   ;;  %s737_s1 = inlined_call_operand.vmem [shape: f32[8,128], index: 1, kind: output, shape index: {}]  }
   0x1   :  { %v348_v0 = vld [vmem:[%s736_s0 + $0xf] ss:$16 sm:%s19_s6]   ;;  %s27_s12 = smov 48  ;;  %s32_s13 = smov 192  ;;  %vm38_vm4 = vcmask 1048512   ;;  %vm60_vm5 = vcmask 982912  }
   0x2   :  { %v349_v1 = vld [vmem:[%s736_s0 + $0xf] ss:$16 sm:%s22_s7]   ;;  %s63_s18 = smov 3  ;;  %s66_s21 = smov 12  ;;  %vm82_vm6 = vcmask 917312   ;;  %vm104_vm7 = vcmask 851712  }
   0x3   :  { %v25_v2 = vsel %vm6_vm0, %v349_v1, %v348_v0  ;;  %v350_v3 = vld [vmem:[%s736_s0 + $0xf] ss:$16 sm:%s27_s12]   ;;  %v356_v6 = vld [vmem:[%s736_s0 + $0xd] ss:$16 sm:%s63_s18]   ;;  %s71_s22 = smov 48  ;;  %s76_s27 = smov 192 }
   0x4   :  { %v351_v4 = vld [vmem:[%s736_s0 + $0xf] ss:$16 sm:%s32_s13]   ;;  %v30_v5 = vsel %vm10_vm1, %v350_v3, %v25_v2  ;;  %v357_v8 = vld [vmem:[%s736_s0 + $0xd] ss:$16 sm:%s66_s21]   ;;  %s423_s28 = smov 120   ;;  %s41_s2 = smov 3 }
   0x5   :  { %v35_v7 = vsel %vm14_vm2, %v351_v4, %v30_v5  ;;  %v358_v9 = vld [vmem:[%s736_s0 + $0xd] ss:$16 sm:%s71_s22]   ;;  %v69_v10 = vsel %vm6_vm0, %v357_v8, %v356_v6  ;;  %s44_s3 = smov 12  ;;  %v352_v13 = vld [vmem:[%s736_s0 + $0xe] ss:$16 sm:%s41_s2]   ;;  %s49_s8 = smov 48 }
   0x6   :  { %36 = vrot.lane.b32.xlu0 %v35_v7, %s423_s28  ;;  %v359_v11 = vld [vmem:[%s736_s0 + $0xd] ss:$16 sm:%s76_s27]   ;;  %v74_v12 = vsel %vm10_vm1, %v358_v9, %v69_v10  ;;  %s54_s9 = smov 192  ;;  %s85_s14 = smov 3  ;;  %vm126_vm8 = vcmask 786112   ;;  %vm148_vm9 = vcmask 720512  }
   0x7   :  { %v353_v14 = vld [vmem:[%s736_s0 + $0xe] ss:$16 sm:%s44_s3]   ;;  %v79_v15 = vsel %vm14_vm2, %v359_v11, %v74_v12  ;;  %s424_s15 = smov 104   ;;  %v360_v20 = vld [vmem:[%s736_s0 + $0xc] ss:$16 sm:%s85_s14]   ;;  %s88_s18 = smov 12 }
   0x8   :  { %v47_v16 = vsel %vm6_vm0, %v353_v14, %v352_v13  ;;  %v354_v17 = vld [vmem:[%s736_s0 + $0xe] ss:$16 sm:%s49_s8]   ;;  %80 = vrot.lane.b32.xlu1 %v79_v15, %s424_s15  ;;  %s93_s19 = smov 48  ;;  %s98_s24 = smov 192  ;;  %vm170_vm10 = vcmask 654912   ;;  %vm192_vm11 = vcmask 589312  }
   0x9   :  { %v355_v18 = vld [vmem:[%s736_s0 + $0xe] ss:$16 sm:%s54_s9]   ;;  %v52_v19 = vsel %vm10_vm1, %v354_v17, %v47_v16  ;;  %v361_v22 = vld [vmem:[%s736_s0 + $0xc] ss:$16 sm:%s88_s18]   ;;  %s425_s25 = smov 112   ;;  %s107_s28 = smov 3 }
   0xa   :  { %v57_v21 = vsel %vm14_vm2, %v355_v18, %v52_v19  ;;  %v362_v23 = vld [vmem:[%s736_s0 + $0xc] ss:$16 sm:%s93_s19]   ;;  %v91_v24 = vsel %vm6_vm0, %v361_v22, %v360_v20  ;;  %s110_s29 = smov 12  ;;  %v364_v27 = vld [vmem:[%s736_s0 + $0xb] ss:$16 sm:%s107_s28]   ;;  %s115_s5 = smov 48 }
   0xb   :  { %58 = vrot.lane.b32.xlu0 %v57_v21, %s425_s25  ;;  %v363_v25 = vld [vmem:[%s736_s0 + $0xc] ss:$16 sm:%s98_s24]   ;;  %v96_v26 = vsel %vm10_vm1, %v362_v23, %v91_v24  ;;  %s120_s6 = smov 192  ;;  %s129_s11 = smov 3  ;;  %vm214_vm12 = vcmask 523712   ;;  %vm236_vm13 = vcmask 458112  }
   0xc   :  { %v365_v28 = vld [vmem:[%s736_s0 + $0xb] ss:$16 sm:%s110_s29]   ;;  %v101_v29 = vsel %vm14_vm2, %v363_v25, %v96_v26  ;;  %s426_s12 = smov 96   ;;  %v368_v34 = vld [vmem:[%s736_s0 + $0xa] ss:$16 sm:%s129_s11]   ;;  %s132_s15 = smov 12 }
   0xd   :  { %v113_v30 = vsel %vm6_vm0, %v365_v28, %v364_v27  ;;  %v366_v31 = vld [vmem:[%s736_s0 + $0xb] ss:$16 sm:%s115_s5]   ;;  %102 = vrot.lane.b32.xlu1 %v101_v29, %s426_s12  ;;  %s137_s16 = smov 48  ;;  %s142_s21 = smov 192  ;;  %vm258_vm14 = vcmask 392512   ;;  %vm280_vm15 = vcmask 326912  }
   0xe   :  { %v367_v32 = vld [vmem:[%s736_s0 + $0xb] ss:$16 sm:%s120_s6]   ;;  %v118_v33 = vsel %vm10_vm1, %v366_v31, %v113_v30  ;;  %v369_v36 = vld [vmem:[%s736_s0 + $0xa] ss:$16 sm:%s132_s15]   ;;  %s427_s22 = smov 88   ;;  %s151_s25 = smov 3 }
   0xf   :  { %v123_v35 = vsel %vm14_vm2, %v367_v32, %v118_v33  ;;  %v370_v37 = vld [vmem:[%s736_s0 + $0xa] ss:$16 sm:%s137_s16]   ;;  %v135_v38 = vsel %vm6_vm0, %v369_v36, %v368_v34  ;;  %s154_s26 = smov 12  ;;  %v372_v41 = vld [vmem:[%s736_s0 + $0x9] ss:$16 sm:%s151_s25]   ;;  %s159_s2 = smov 48 }
  0x10   :  { %124 = vrot.lane.b32.xlu0 %v123_v35, %s427_s22  ;;  %v371_v39 = vld [vmem:[%s736_s0 + $0xa] ss:$16 sm:%s142_s21]   ;;  %v140_v40 = vsel %vm10_vm1, %v370_v37, %v135_v38  ;;  %s164_s3 = smov 192  ;;  %s173_s8 = smov 3 }
  0x11   :  { %v373_v42 = vld [vmem:[%s736_s0 + $0x9] ss:$16 sm:%s154_s26]   ;;  %v145_v43 = vsel %vm14_vm2, %v371_v39, %v140_v40  ;;  %s428_s9 = smov 80   ;;  %v376_v48 = vld [vmem:[%s736_s0 + $0x8] ss:$16 sm:%s173_s8]   ;;  %s176_s12 = smov 12 }
  0x12   :  { %v157_v44 = vsel %vm6_vm0, %v373_v42, %v372_v41  ;;  %v374_v45 = vld [vmem:[%s736_s0 + $0x9] ss:$16 sm:%s159_s2]   ;;  %146 = vrot.lane.b32.xlu1 %v145_v43, %s428_s9  ;;  %s181_s13 = smov 48  ;;  %s186_s18 = smov 192 }
  0x13   :  { %v375_v46 = vld [vmem:[%s736_s0 + $0x9] ss:$16 sm:%s164_s3]   ;;  %v162_v47 = vsel %vm10_vm1, %v374_v45, %v157_v44  ;;  %v377_v50 = vld [vmem:[%s736_s0 + $0x8] ss:$16 sm:%s176_s12]   ;;  %s429_s19 = smov 72   ;;  %s195_s22 = smov 3 }
  0x14   :  { %v167_v49 = vsel %vm14_vm2, %v375_v46, %v162_v47  ;;  %v378_v51 = vld [vmem:[%s736_s0 + $0x8] ss:$16 sm:%s181_s13]   ;;  %v179_v52 = vsel %vm6_vm0, %v377_v50, %v376_v48  ;;  %s198_s23 = smov 12  ;;  %v380_v55 = vld [vmem:[%s736_s0 + $0x7] ss:$16 sm:%s195_s22]   ;;  %s203_s28 = smov 48 }
  0x15   :  { %168 = vrot.lane.b32.xlu0 %v167_v49, %s429_s19  ;;  %v379_v53 = vld [vmem:[%s736_s0 + $0x8] ss:$16 sm:%s186_s18]   ;;  %v184_v54 = vsel %vm10_vm1, %v378_v51, %v179_v52  ;;  %s208_s29 = smov 192  ;;  %s217_s5 = smov 3 }
  0x16   :  { %v381_v56 = vld [vmem:[%s736_s0 + $0x7] ss:$16 sm:%s198_s23]   ;;  %v189_v57 = vsel %vm14_vm2, %v379_v53, %v184_v54  ;;  %s430_s6 = smov 64   ;;  %v384_v62 = vld [vmem:[%s736_s0 + $0x6] ss:$16 sm:%s217_s5]   ;;  %s220_s9 = smov 12 }
  0x17   :  { %v201_v58 = vsel %vm6_vm0, %v381_v56, %v380_v55  ;;  %v382_v59 = vld [vmem:[%s736_s0 + $0x7] ss:$16 sm:%s203_s28]   ;;  %190 = vrot.lane.b32.xlu1 %v189_v57, %s430_s6  ;;  %s225_s10 = smov 48  ;;  %s230_s15 = smov 192 }
  0x18   :  { %v383_v60 = vld [vmem:[%s736_s0 + $0x7] ss:$16 sm:%s208_s29]   ;;  %v206_v61 = vsel %vm10_vm1, %v382_v59, %v201_v58  ;;  %v385_v0 = vld [vmem:[%s736_s0 + $0x6] ss:$16 sm:%s220_s9]   ;;  %s431_s16 = smov 56   ;;  %s239_s19 = smov 3 }
  0x19   :  { %v211_v63 = vsel %vm14_vm2, %v383_v60, %v206_v61  ;;  %v386_v1 = vld [vmem:[%s736_s0 + $0x6] ss:$16 sm:%s225_s10]   ;;  %v223_v2 = vsel %vm6_vm0, %v385_v0, %v384_v62  ;;  %s242_s20 = smov 12  ;;  %v388_v5 = vld [vmem:[%s736_s0 + $0x5] ss:$16 sm:%s239_s19]   ;;  %s247_s25 = smov 48 }
  0x1a   :  { %212 = vrot.lane.b32.xlu0 %v211_v63, %s431_s16  ;;  %v387_v3 = vld [vmem:[%s736_s0 + $0x6] ss:$16 sm:%s230_s15]   ;;  %v228_v4 = vsel %vm10_vm1, %v386_v1, %v223_v2  ;;  %s252_s26 = smov 192  ;;  %s261_s2 = smov 3 }
  0x1b   :  { %v389_v6 = vld [vmem:[%s736_s0 + $0x5] ss:$16 sm:%s242_s20]   ;;  %v233_v7 = vsel %vm14_vm2, %v387_v3, %v228_v4  ;;  %s432_s3 = smov 48   ;;  %v392_v12 = vld [vmem:[%s736_s0 + $0x4] ss:$16 sm:%s261_s2]   ;;  %s264_s6 = smov 12 }
  0x1c   :  { %v245_v8 = vsel %vm6_vm0, %v389_v6, %v388_v5  ;;  %v390_v9 = vld [vmem:[%s736_s0 + $0x5] ss:$16 sm:%s247_s25]   ;;  %234 = vrot.lane.b32.xlu1 %v233_v7, %s432_s3  ;;  %s269_s7 = smov 48  ;;  %s274_s12 = smov 192 }
  0x1d   :  { %v391_v10 = vld [vmem:[%s736_s0 + $0x5] ss:$16 sm:%s252_s26]   ;;  %v250_v11 = vsel %vm10_vm1, %v390_v9, %v245_v8  ;;  %v393_v14 = vld [vmem:[%s736_s0 + $0x4] ss:$16 sm:%s264_s6]   ;;  %s433_s13 = smov 40   ;;  %s283_s16 = smov 3 }
  0x1e   :  { %v255_v13 = vsel %vm14_vm2, %v391_v10, %v250_v11  ;;  %v394_v15 = vld [vmem:[%s736_s0 + $0x4] ss:$16 sm:%s269_s7]   ;;  %v267_v16 = vsel %vm6_vm0, %v393_v14, %v392_v12  ;;  %s286_s17 = smov 12  ;;  %v396_v19 = vld [vmem:[%s736_s0 + $0x3] ss:$16 sm:%s283_s16]   ;;  %s291_s22 = smov 48 }
  0x1f   :  { %256 = vrot.lane.b32.xlu0 %v255_v13, %s433_s13  ;;  %v395_v17 = vld [vmem:[%s736_s0 + $0x4] ss:$16 sm:%s274_s12]   ;;  %v272_v18 = vsel %vm10_vm1, %v394_v15, %v267_v16  ;;  %s296_s23 = smov 192  ;;  %s305_s28 = smov 3 }
  0x20   :  { %v397_v20 = vld [vmem:[%s736_s0 + $0x3] ss:$16 sm:%s286_s17]   ;;  %v277_v21 = vsel %vm14_vm2, %v395_v17, %v272_v18  ;;  %s434_s29 = smov 32   ;;  %v400_v26 = vld [vmem:[%s736_s0 + $0x2] ss:$16 sm:%s305_s28]   ;;  %s308_s3 = smov 12 }
  0x21   :  { %v289_v22 = vsel %vm6_vm0, %v397_v20, %v396_v19  ;;  %v398_v23 = vld [vmem:[%s736_s0 + $0x3] ss:$16 sm:%s291_s22]   ;;  %278 = vrot.lane.b32.xlu1 %v277_v21, %s434_s29  ;;  %s313_s4 = smov 48  ;;  %s318_s9 = smov 192 }
  0x22   :  { %v399_v24 = vld [vmem:[%s736_s0 + $0x3] ss:$16 sm:%s296_s23]   ;;  %v294_v25 = vsel %vm10_vm1, %v398_v23, %v289_v22  ;;  %v401_v28 = vld [vmem:[%s736_s0 + $0x2] ss:$16 sm:%s308_s3]   ;;  %s435_s10 = smov 24   ;;  %s327_s13 = smov 3 }
  0x23   :  { %v299_v27 = vsel %vm14_vm2, %v399_v24, %v294_v25  ;;  %v402_v29 = vld [vmem:[%s736_s0 + $0x2] ss:$16 sm:%s313_s4]   ;;  %v311_v30 = vsel %vm6_vm0, %v401_v28, %v400_v26  ;;  %s330_s14 = smov 12  ;;  %v404_v33 = vld [vmem:[%s736_s0 + $0x1] ss:$16 sm:%s327_s13]   ;;  %s335_s19 = smov 48 }
  0x24   :  { %300 = vrot.lane.b32.xlu0 %v299_v27, %s435_s10  ;;  %v403_v31 = vld [vmem:[%s736_s0 + $0x2] ss:$16 sm:%s318_s9]   ;;  %v316_v32 = vsel %vm10_vm1, %v402_v29, %v311_v30  ;;  %s340_s20 = smov 192  ;;  %s2_s25 = smov 3 }
  0x25   :  { %v405_v34 = vld [vmem:[%s736_s0 + $0x1] ss:$16 sm:%s330_s14]   ;;  %v321_v35 = vsel %vm14_vm2, %v403_v31, %v316_v32  ;;  %s436_s26 = smov 16   ;;  %s4_s27 = smov 12  ;;  %v3_v40 = vld [vmem:[%s736_s0] ss:$16 sm:%s2_s25]  }
  0x26   :  { %v333_v36 = vsel %vm6_vm0, %v405_v34, %v404_v33  ;;  %v406_v37 = vld [vmem:[%s736_s0 + $0x1] ss:$16 sm:%s335_s19]   ;;  %322 = vrot.lane.b32.xlu1 %v321_v35, %s436_s26  ;;  %s8_s28 = smov 48  ;;  %s12_s2 = smov 192 }
  0x27   :  { %v407_v38 = vld [vmem:[%s736_s0 + $0x1] ss:$16 sm:%s340_s20]   ;;  %v338_v39 = vsel %vm10_vm1, %v406_v37, %v333_v36  ;;  %v5_v42 = vld [vmem:[%s736_s0] ss:$16 sm:%s4_s27]   ;;  %s437_s7 = smov 8  }
  0x28   :  { %v343_v41 = vsel %vm14_vm2, %v407_v38, %v338_v39  ;;  %v9_v43 = vld [vmem:[%s736_s0] ss:$16 sm:%s8_s28]   ;;  %v7_v44 = vsel %vm6_vm0, %v5_v42, %v3_v40  ;;  %vm302_vm0 = vcmask 261312  }
  0x29   :  { %344 = vrot.lane.b32.xlu0 %v343_v41, %s437_s7  ;;  %v13_v45 = vld [vmem:[%s736_s0] ss:$16 sm:%s12_s2]   ;;  %v11_v46 = vsel %vm10_vm1, %v9_v43, %v7_v44  ;;  %vm324_vm1 = vcmask 195712  }
  0x2a   :  { %v15_v47 = vsel %vm14_vm2, %v13_v45, %v11_v46  ;;  %vm346_vm2 = vcmask 130112  }
  0x2b   :  { %17 = vst.msk [vmem:[%s737_s1] sm:$0xff] %vm16_vm3, %v15_v47  }
  0x78   :  { %v37_v48 = vpop.permute.xlu0 %36  }
  0x79   :  { %39 = vst.msk [vmem:[%s737_s1] sm:$0xff] %vm38_vm4, %v37_v48  }
  0x7a   :  { %v81_v49 = vpop.permute.xlu1 %80  }
  0x7d   :  { %v59_v50 = vpop.permute.xlu0 %58  }
  0x7e   :  { %61 = vst.msk [vmem:[%s737_s1] sm:$0xff] %vm60_vm5, %v59_v50  }
  0x7f   :  { %83 = vst.msk [vmem:[%s737_s1] sm:$0xff] %vm82_vm6, %v81_v49   ;;  %v103_v51 = vpop.permute.xlu1 %102  }
  0x80   :  { %105 = vst.msk [vmem:[%s737_s1] sm:$0xff] %vm104_vm7, %v103_v51  }
  0x82   :  { %v125_v52 = vpop.permute.xlu0 %124  }
  0x83   :  { %127 = vst.msk [vmem:[%s737_s1] sm:$0xff] %vm126_vm8, %v125_v52  }
  0x84   :  { %v147_v53 = vpop.permute.xlu1 %146  }
  0x85   :  { %149 = vst.msk [vmem:[%s737_s1] sm:$0xff] %vm148_vm9, %v147_v53  }
  0x87   :  { %v169_v54 = vpop.permute.xlu0 %168  }
  0x88   :  { %171 = vst.msk [vmem:[%s737_s1] sm:$0xff] %vm170_vm10, %v169_v54  }
  0x89   :  { %v191_v55 = vpop.permute.xlu1 %190  }
  0x8a   :  { %193 = vst.msk [vmem:[%s737_s1] sm:$0xff] %vm192_vm11, %v191_v55  }
  0x8c   :  { %v213_v56 = vpop.permute.xlu0 %212  }
  0x8d   :  { %215 = vst.msk [vmem:[%s737_s1] sm:$0xff] %vm214_vm12, %v213_v56  }
  0x8e   :  { %v235_v57 = vpop.permute.xlu1 %234  }
  0x8f   :  { %237 = vst.msk [vmem:[%s737_s1] sm:$0xff] %vm236_vm13, %v235_v57  }
  0x91   :  { %v257_v58 = vpop.permute.xlu0 %256  }
  0x92   :  { %259 = vst.msk [vmem:[%s737_s1] sm:$0xff] %vm258_vm14, %v257_v58  }
  0x93   :  { %v279_v59 = vpop.permute.xlu1 %278  }
  0x94   :  { %281 = vst.msk [vmem:[%s737_s1] sm:$0xff] %vm280_vm15, %v279_v59  }
  0x96   :  { %v301_v60 = vpop.permute.xlu0 %300  }
  0x97   :  { %303 = vst.msk [vmem:[%s737_s1] sm:$0xff] %vm302_vm0, %v301_v60  }
  0x98   :  { %v323_v61 = vpop.permute.xlu1 %322  }
  0x99   :  { %325 = vst.msk [vmem:[%s737_s1] sm:$0xff] %vm324_vm1, %v323_v61  }
  0x9b   :  { %v345_v62 = vpop.permute.xlu0 %344  }
  0x9c   :  { %347 = vst.msk [vmem:[%s737_s1] sm:$0xff] %vm346_vm2, %v345_v62  }

// kernel: tile.33
= control target key start
LH: loop header
LB: loop body
LE: loop exit
PB: predicated region body
PF: predicated region fallthrough
CT: control target
= control target key end

     0   :  { %s28_s0 = inlined_call_operand.vmem [shape: f32[8], index: 0, kind: input, shape index: {}]   ;;  %s29_s1 = inlined_call_operand.vmem [shape: f32[16,8], index: 1, kind: output, shape index: {}]  }
   0x1   :  { %v4_v0 = vld [vmem:[%s28_s0] ss:$0 sm:$0xff] }
   0x2   :  { %5 = vst [vmem:[%s29_s1] sm:$0xff] %v4_v0  ;;  %8 = vst [vmem:[%s29_s1 + $0x8] sm:$0xff] %v4_v0 }

// kernel: tile.34
= control target key start
LH: loop header
LB: loop body
LE: loop exit
PB: predicated region body
PF: predicated region fallthrough
CT: control target
= control target key end

     0   :  { %s131_s10 = smov 120   ;;  %s132_s11 = smov 104   ;;  %vm3_vm0 = vcmask 64512   ;;  %vm9_vm1 = vcmask 1048512   ;;  %vm15_vm2 = vcmask 982912   ;;  %vm21_vm3 = vcmask 917312   ;;  %s207_s0 = inlined_call_operand.vmem [shape: f32[16,8], index: 0, kind: input, shape index: {}]   ;;  %s208_s1 = inlined_call_operand.vmem [shape: f32[1,128], index: 1, kind: output, shape index: {}]  }
   0x1   :  { %v101_v0 = vld [vmem:[%s207_s0 + $0xf] sm:$0x1]   ;;  %v103_v1 = vld [vmem:[%s207_s0 + $0xd] sm:$0x1]   ;;  %v102_v2 = vld [vmem:[%s207_s0 + $0xe] sm:$0x1]  }
   0x2   :  { %7 = vrot.lane.b32.xlu0 %v101_v0, %s131_s10  ;;  %19 = vrot.lane.b32.xlu1 %v103_v1, %s132_s11  ;;  %v104_v3 = vld [vmem:[%s207_s0 + $0xc] sm:$0x1]   ;;  %s133_s16 = smov 112   ;;  %s134_s17 = smov 96   ;;  %v105_v4 = vld [vmem:[%s207_s0 + $0xb] sm:$0x1]  }
   0x3   :  { %v106_v5 = vld [vmem:[%s207_s0 + $0xa] sm:$0x1]   ;;  %v2_v6 = vld [vmem:[%s207_s0] sm:$0x1]   ;;  %s135_s24 = smov 88   ;;  %s136_s25 = smov 80  }
   0x4   :  { %4 = vst.msk [vmem:[#allocation0] sm:$0x1] %vm3_vm0, %v2_v6   ;;  %v107_v7 = vld [vmem:[%s207_s0 + $0x9] sm:$0x1]   ;;  %v108_v8 = vld [vmem:[%s207_s0 + $0x8] sm:$0x1]  }
   0x5   :  { %s137_s30 = smov 72   ;;  %s138_s2 = smov 64   ;;  %v109_v9 = vld [vmem:[%s207_s0 + $0x7] sm:$0x1]   ;;  %v110_v10 = vld [vmem:[%s207_s0 + $0x6] sm:$0x1]  }
   0x6   :  { %13 = vrot.lane.b32.xlu0 %v102_v2, %s133_s16  ;;  %25 = vrot.lane.b32.xlu1 %v104_v3, %s134_s17  ;;  %s139_s7 = smov 56   ;;  %s140_s8 = smov 48   ;;  %v111_v11 = vld [vmem:[%s207_s0 + $0x5] sm:$0x1]   ;;  %v112_v12 = vld [vmem:[%s207_s0 + $0x4] sm:$0x1]  }
   0x7   :  { %s141_s13 = smov 40   ;;  %s142_s14 = smov 32   ;;  %v113_v13 = vld [vmem:[%s207_s0 + $0x3] sm:$0x1]   ;;  %v114_v14 = vld [vmem:[%s207_s0 + $0x2] sm:$0x1]  }
   0x8   :  { %s143_s19 = smov 24   ;;  %s144_s20 = smov 16   ;;  %v115_v15 = vld [vmem:[%s207_s0 + $0x1] sm:$0x1]   ;;  %vm27_vm4 = vcmask 851712   ;;  %vm33_vm5 = vcmask 786112  }
   0x9   :  { %s145_s0 = smov 8   ;;  %vm39_vm6 = vcmask 720512   ;;  %vm45_vm7 = vcmask 654912   ;;  %vm51_vm8 = vcmask 589312   ;;  %vm57_vm9 = vcmask 523712  }
   0xa   :  { %31 = vrot.lane.b32.xlu0 %v105_v4, %s135_s24  ;;  %37 = vrot.lane.b32.xlu1 %v106_v5, %s136_s25  ;;  %vm63_vm10 = vcmask 458112   ;;  %vm69_vm11 = vcmask 392512   ;;  %vm75_vm12 = vcmask 326912   ;;  %vm81_vm13 = vcmask 261312  }
   0xb   :  { %vm87_vm14 = vcmask 195712   ;;  %vm93_vm15 = vcmask 130112  }
   0xe   :  { %43 = vrot.lane.b32.xlu0 %v107_v7, %s137_s30  ;;  %49 = vrot.lane.b32.xlu1 %v108_v8, %s138_s2 }
  0x12   :  { %55 = vrot.lane.b32.xlu0 %v109_v9, %s139_s7  ;;  %61 = vrot.lane.b32.xlu1 %v110_v10, %s140_s8 }
  0x16   :  { %67 = vrot.lane.b32.xlu0 %v111_v11, %s141_s13  ;;  %73 = vrot.lane.b32.xlu1 %v112_v12, %s142_s14 }
  0x1a   :  { %79 = vrot.lane.b32.xlu0 %v113_v13, %s143_s19  ;;  %85 = vrot.lane.b32.xlu1 %v114_v14, %s144_s20 }
  0x1e   :  { %91 = vrot.lane.b32.xlu0 %v115_v15, %s145_s0 }
  0x74   :  { %v8_v16 = vpop.permute.xlu0 %7   ;;  %v20_v17 = vpop.permute.xlu1 %19  }
  0x75   :  { %10 = vst.msk [vmem:[#allocation0] sm:$0x1] %vm9_vm1, %v8_v16  }
  0x78   :  { %v14_v18 = vpop.permute.xlu0 %13   ;;  %v26_v19 = vpop.permute.xlu1 %25  }
  0x79   :  { %16 = vst.msk [vmem:[#allocation0] sm:$0x1] %vm15_vm2, %v14_v18  }
  0x7a   :  { %22 = vst.msk [vmem:[#allocation0] sm:$0x1] %vm21_vm3, %v20_v17  }
  0x7b   :  { %28 = vst.msk [vmem:[#allocation0] sm:$0x1] %vm27_vm4, %v26_v19  }
  0x7c   :  { %v32_v20 = vpop.permute.xlu0 %31   ;;  %v38_v21 = vpop.permute.xlu1 %37  }
  0x7d   :  { %34 = vst.msk [vmem:[#allocation0] sm:$0x1] %vm33_vm5, %v32_v20  }
  0x7e   :  { %40 = vst.msk [vmem:[#allocation0] sm:$0x1] %vm39_vm6, %v38_v21  }
  0x80   :  { %v44_v22 = vpop.permute.xlu0 %43   ;;  %v50_v23 = vpop.permute.xlu1 %49  }
  0x81   :  { %46 = vst.msk [vmem:[#allocation0] sm:$0x1] %vm45_vm7, %v44_v22  }
  0x82   :  { %52 = vst.msk [vmem:[#allocation0] sm:$0x1] %vm51_vm8, %v50_v23  }
  0x84   :  { %v56_v24 = vpop.permute.xlu0 %55   ;;  %v62_v25 = vpop.permute.xlu1 %61  }
  0x85   :  { %58 = vst.msk [vmem:[#allocation0] sm:$0x1] %vm57_vm9, %v56_v24  }
  0x86   :  { %64 = vst.msk [vmem:[#allocation0] sm:$0x1] %vm63_vm10, %v62_v25  }
  0x88   :  { %v68_v26 = vpop.permute.xlu0 %67   ;;  %v74_v27 = vpop.permute.xlu1 %73  }
  0x89   :  { %70 = vst.msk [vmem:[#allocation0] sm:$0x1] %vm69_vm11, %v68_v26  }
  0x8a   :  { %76 = vst.msk [vmem:[#allocation0] sm:$0x1] %vm75_vm12, %v74_v27  }
  0x8c   :  { %v80_v28 = vpop.permute.xlu0 %79   ;;  %v86_v29 = vpop.permute.xlu1 %85  }
  0x8d   :  { %82 = vst.msk [vmem:[#allocation0] sm:$0x1] %vm81_vm13, %v80_v28  }
  0x8e   :  { %88 = vst.msk [vmem:[#allocation0] sm:$0x1] %vm87_vm14, %v86_v29  }
  0x90   :  { %v92_v30 = vpop.permute.xlu0 %91  }
  0x91   :  { %94 = vst.msk [vmem:[#allocation0] sm:$0x1] %vm93_vm15, %v92_v30  }
  0x98   :  { %v98_v31 = vld [vmem:[#allocation0] sm:$0x1] }
  0x99   :  { %100 = vst [vmem:[%s208_s1] sm:$0x1] %v98_v31 }

// kernel: unet_conv_block.1
= control target key start
LH: loop header
LB: loop body
LE: loop exit
PB: predicated region body
PF: predicated region fallthrough
CT: control target
= control target key end

     0   :  { %v2367_v0 = vmov 0   ;;  %vm168_vm0 = vcmask 523264   ;;  %vm77_vm1 = vcmask 1040384   ;;  %vm114_vm2 = vcmask 1046528   ;;  %s3050_s1 = inlined_call_operand.vmem [shape: f32[32,1], index: 1, kind: input, shape index: {}]   ;;  %s3051_s3 = inlined_call_operand.vmem [shape: f32[3,64,128], index: 3, kind: input, shape index: {}]   ;;  %s3052_s2 = inlined_call_operand.vmem [shape: f32[32,1], index: 2, kind: input, shape index: {}]   ;;  %s3053_s0 = inlined_call_operand.vmem [shape: f32[32,64], index: 0, kind: input, shape index: {}]   ;;  %s3054_s11 = inlined_call_operand.vmem [shape: f32[128,8], index: 11, kind: input, shape index: {}]   ;;  %s3055_s4 = inlined_call_operand.vmem [shape: f32[1,128], index: 4, kind: input, shape index: {}]   ;;  %s3056_s12 = inlined_call_operand.vmem [shape: f32[8,128], index: 12, kind: input, shape index: {}]   ;;  %s3057_s5 = inlined_call_operand.vmem [shape: f32[1,8], index: 5, kind: input, shape index: {}]   ;;  %s3058_s7 = inlined_call_operand.vmem [shape: f32[3,128,128], index: 7, kind: input, shape index: {}]   ;;  %s3059_s6 = inlined_call_operand.vmem [shape: f32[1,8], index: 6, kind: input, shape index: {}]   ;;  %s3060_s8 = inlined_call_operand.vmem [shape: f32[1,128], index: 8, kind: input, shape index: {}]   ;;  %s3061_s9 = inlined_call_operand.vmem [shape: f32[1,8], index: 9, kind: input, shape index: {}]   ;;  %s3062_s10 = inlined_call_operand.vmem [shape: f32[1,8], index: 10, kind: input, shape index: {}]   ;;  %s3063_s13 = inlined_call_operand.vmem [shape: f32[32,128], index: 13, kind: output, shape index: {}]  }
   0x1   :  { %2362 = vset.pattern.permute.xlu1 %v2367_v0  ;;  %2361 = vset.pattern.permute.xlu0 %v2367_v0  ;;  %v46_v1 = vld [vmem:[%s3050_s1 + $0x10] sm:$0xff]  ;;  %v44_v2 = vld [vmem:[%s3050_s1] sm:$0xff]  ;;  %v47_v3 = vld [vmem:[%s3050_s1 + $0x18] sm:$0xff]  ;;  %v2368_v54 = vmov 0.0|0.0   ;;  %vm2369_vm3 = vmmov 0   ;;  %vm657_vm4 = vcmask 64512  }
   0x2   :  { %102 = vperm.xlu1 %2362, %v46_v1   ;;  %92 = vperm.xlu0 %2361, %v44_v2   ;;  %v45_v4 = vld [vmem:[%s3050_s1 + $0x8] sm:$0xff]  ;;  %v151_v5 = vld [vmem:[%s3051_s3] sm:$0xff]  ;;  %v153_v7 = vld [vmem:[%s3051_s3 + $0x10] sm:$0xff] }
   0x3   :  { %v152_v6 = vld [vmem:[%s3051_s3 + $0x8] sm:$0xff]  ;;  %v154_v8 = vld [vmem:[%s3051_s3 + $0x18] sm:$0xff]  ;;  %v48_v10 = vld [vmem:[%s3052_s2] sm:$0xff] }
   0x4   :  { %v49_v9 = vld [vmem:[%s3052_s2 + $0x8] sm:$0xff]  ;;  %v2117_v11 = vpack.c.bf16 %v152_v6, %v151_v5  ;;  %v2121_v12 = vpack.c.bf16 %v154_v8, %v153_v7  ;;  %v155_v14 = vld [vmem:[%s3051_s3 + $0x20] sm:$0xff]  ;;  %v2485_v16 = vld [vmem:[%s3053_s0 + $0x10] sm:$0xff] }
   0x5   :  { %v2474_v13 = vld [vmem:[%s3053_s0 + $0x8] sm:$0xff]  ;;  %v81_v18 = vrot.slane %v2485_v16, 7  ;;  %v2492_v19 = vld [vmem:[%s3053_s0] sm:$0xff]  ;;  %v2497_v20 = vld [vmem:[%s3053_s0 + $0x18] sm:$0xff]  ;;  %v118_v35 = vrot.slane %v2485_v16, 1 }
   0x6   :  { %107 = vperm.xlu1 %2362, %v47_v3   ;;  %97 = vperm.xlu0 %2361, %v45_v4   ;;  %v156_v15 = vld [vmem:[%s3051_s3 + $0x28] sm:$0xff]  ;;  %v79_v17 = vrot.slane %v2474_v13, 7  ;;  %v1523_v21 = vld [vmem:[%s3051_s3 + $0x40] sm:$0xff]  ;;  %v78_v22 = vrot.slane %v2492_v19, 7  ;;  %v83_v23 = vrot.slane %v2497_v20, 7  ;;  %v116_v28 = vrot.slane %v2474_v13, 1 }
   0x7   :  { %2118 = vmatprep.subr.bf16.mxu0 %v2117_v11  ;;  %v1524_v24 = vld [vmem:[%s3051_s3 + $0x48] sm:$0xff]  ;;  %1777 = vmatprep.mubr.msk.f32.mxu1 %vm168_vm0, %v2492_v19  ;;  %v2125_v25 = vpack.c.bf16 %v156_v15, %v155_v14  ;;  %v1525_v29 = vld [vmem:[%s3051_s3 + $0x50] sm:$0xff]  ;;  %v1526_v30 = vld [vmem:[%s3051_s3 + $0x58] sm:$0xff]  ;;  %v115_v38 = vrot.slane %v2492_v19, 1  ;;  %v120_v41 = vrot.slane %v2497_v20, 1 }
   0x8   :  { %2120 = vmatpush3.bf16.msra.mxu0 %v2117_v11  ;;  %v2510_v26 = vsel %vm77_vm1, %v79_v17, %v81_v18  ;;  %v2101_v27 = vpack.c.bf16 %v1524_v24, %v1523_v21  ;;  %v157_v31 = vld [vmem:[%s3051_s3 + $0x30] sm:$0xff]  ;;  %v158_v32 = vld [vmem:[%s3051_s3 + $0x38] sm:$0xff]  ;;  %v2526_v33 = vsel %vm77_vm1, %v81_v18, %v83_v23  ;;  %v80_v34 = vsel %vm77_vm1, %v78_v22, %v79_v17  ;;  %v1527_v42 = vld [vmem:[%s3051_s3 + $0x60] sm:$0xff] }
   0x9   :  { %2122 = vmatprep.subr.bf16.mxu0 %v2121_v12  ;;  %v51_v36 = vld [vmem:[%s3052_s2 + $0x18] sm:$0xff]  ;;  %v50_v37 = vld [vmem:[%s3052_s2 + $0x10] sm:$0xff]  ;;  %v2105_v39 = vpack.c.bf16 %v1526_v30, %v1525_v29  ;;  %v2540_v40 = vsel %vm114_vm2, %v116_v28, %v118_v35  ;;  %v1528_v43 = vld [vmem:[%s3051_s3 + $0x68] sm:$0xff]  ;;  %v2129_v44 = vpack.c.bf16 %v158_v32, %v157_v31  ;;  %v117_v45 = vsel %vm114_vm2, %v115_v38, %v116_v28 }
   0xa   :  { %134 = vperm.xlu1 %2362, %v49_v9   ;;  %129 = vperm.xlu0 %2361, %v48_v10   ;;  %v2109_v46 = vpack.c.bf16 %v1528_v43, %v1527_v42  ;;  %v1539_v47 = vld [vmem:[%s3051_s3 + $0x80] sm:$0xff]  ;;  %v1540_v48 = vld [vmem:[%s3051_s3 + $0x88] sm:$0xff]  ;;  %v121_v49 = vsel %vm114_vm2, %v118_v35, %v120_v41  ;;  %v1529_v50 = vld [vmem:[%s3051_s3 + $0x70] sm:$0xff]  ;;  %v89_v58 = vsel %vm77_vm1, 0.0, %v78_v22  ;;  %v126_v18 = vsel %vm114_vm2, %v120_v41, 0.0 }
   0xb   :  { %2102 = vmatprep.subr.bf16.mxu1 %v2101_v27  ;;  %v1530_v51 = vld [vmem:[%s3051_s3 + $0x78] sm:$0xff]  ;;  %v2133_v52 = vpack.c.bf16 %v1540_v48, %v1539_v47  ;;  %v52_v55 = vld [vmem:[%s3054_s11] sm:$0xff]  ;;  %v53_v56 = vld [vmem:[%s3054_s11 + $0x8] sm:$0xff] }
   0xc   :  { %2124 = vmatpush3.bf16.msra.mxu0 %v2121_v12  ;;  %2104 = vmatpush3.bf16.msra.mxu1 %v2101_v27  ;;  %v2113_v53 = vpack.c.bf16 %v1530_v51, %v1529_v50  ;;  %v2576_v57 = vpack.c.bf16 %v53_v56, %v52_v55  ;;  %v1541_v62 = vld [vmem:[%s3051_s3 + $0x90] sm:$0xff]  ;;  %v1542_v63 = vld [vmem:[%s3051_s3 + $0x98] sm:$0xff]  ;;  %v1543_v5 = vld [vmem:[%s3051_s3 + $0xa0] sm:$0xff] }
   0xd   :  { %2126 = vmatprep.subr.bf16.mxu0 %v2125_v25  ;;  %2106 = vmatprep.subr.bf16.mxu1 %v2105_v39  ;;  %v2137_v3 = vpack.c.bf16 %v1542_v63, %v1541_v62  ;;  %v1544_v6 = vld [vmem:[%s3051_s3 + $0xa8] sm:$0xff]  ;;  %v1545_v11 = vld [vmem:[%s3051_s3 + $0xb0] sm:$0xff]  ;;  %v1546_v12 = vld [vmem:[%s3051_s3 + $0xb8] sm:$0xff] }
   0xe   :  { %144 = vperm.xlu1 %2362, %v51_v36   ;;  %139 = vperm.xlu0 %2361, %v50_v37   ;;  %v2141_v10 = vpack.c.bf16 %v1544_v6, %v1543_v5  ;;  %v54_v22 = vld [vmem:[%s3054_s11 + $0x10] sm:$0xff]  ;;  %v56_v24 = vld [vmem:[%s3054_s11 + $0x20] sm:$0xff]  ;;  %v59_v30 = vld [vmem:[%s3054_s11 + $0x38] sm:$0xff] }
   0xf   :  { %v58_v29 = vld [vmem:[%s3054_s11 + $0x30] sm:$0xff]  ;;  %v61_v35 = vld [vmem:[%s3054_s11 + $0x48] sm:$0xff]  ;;  %v63_v38 = vld [vmem:[%s3054_s11 + $0x58] sm:$0xff] }
  0x10   :  { %2128 = vmatpush3.bf16.msra.mxu0 %v2125_v25  ;;  %2108 = vmatpush3.bf16.msra.mxu1 %v2105_v39  ;;  %v57_v25 = vld [vmem:[%s3054_s11 + $0x28] sm:$0xff]  ;;  %v2667_v31 = vpack.c.bf16 %v59_v30, %v58_v29  ;;  %v62_v37 = vld [vmem:[%s3054_s11 + $0x50] sm:$0xff]  ;;  %v1551_v48 = vld [vmem:[%s3055_s4] ss:$0 sm:$0xff] }
  0x11   :  { %2130 = vmatprep.subr.bf16.mxu0 %v2129_v44  ;;  %2110 = vmatprep.subr.bf16.mxu1 %v2109_v46  ;;  %v2687_v39 = vpack.c.bf16 %v63_v38, %v62_v37  ;;  %v65_v41 = vld [vmem:[%s3054_s11 + $0x68] sm:$0xff]  ;;  %v66_v43 = vld [vmem:[%s3054_s11 + $0x70] sm:$0xff] }
  0x14   :  { %2132 = vmatpush3.bf16.msra.mxu0 %v2129_v44  ;;  %2112 = vmatpush3.bf16.msra.mxu1 %v2109_v46  ;;  %v67_v44 = vld [vmem:[%s3054_s11 + $0x78] sm:$0xff]  ;;  %v2370_v46 = vmov 0.0  }
  0x15   :  { %2134 = vmatprep.subr.bf16.mxu0 %v2133_v52  ;;  %2114 = vmatprep.subr.bf16.mxu1 %v2113_v53 }
  0x18   :  { %2116 = vmatpush3.bf16.msra.mxu1 %v2113_v53 }
  0x19   :  { %2149 = vmatprep.subr.bf16.mxu1 %v2368_v54 }
  0x1b   :  { %1778 = vmatmul.mubr.msk.f32.vlgmr.msra.gmra.mrb[0].mxu1 %vm168_vm0, %v2474_v13  ;;  %v2145_v13 = vpack.c.bf16 %v1546_v12, %v1545_v11 }
  0x1c   :  { %1780 = vmatprep.mubr.msk.f32.mxu1 %vm168_vm0, %v2485_v16  ;;  %2151 = vmatpush3.bf16.msra.mxu1 %v2576_v57 }
  0x1d   :  { %2152 = vmatprep.subr.bf16.mxu1 %v2368_v54 }
  0x1f   :  { %1781 = vmatmul.mubr.msk.f32.gmra.mrb[2].mxu1 %vm168_vm0, %v2497_v20  ;;  %v55_v20 = vld [vmem:[%s3054_s11 + $0x18] sm:$0xff] }
  0x20   :  { %v2647_v23 = vpack.c.bf16 %v55_v20, %v54_v22  ;;  %1859 = vmatprep.mubr.msk.f32.mxu1 %vm2369_vm3, %v2370_v46 }
  0x22   :  { %2154 = vmatpush3.bf16.msra.mxu1 %v2647_v23 }
  0x23   :  { %2155 = vmatprep.subr.bf16.mxu1 %v2368_v54 }
  0x81   :  { %v2585_v59 = vpop.permute.xlu1 %102  ;;  %v2587_v60 = vpop.permute.xlu0 %92 }
  0x82   :  { %v110_v61 = vmul.f32 %v2587_v60, %v89_v58  ;;  %v112_v0 = vmul.f32 %v2585_v59, %v2510_v26  ;;  %v2657_v26 = vpack.c.bf16 %v57_v25, %v56_v24 }
  0x84   :  { %1799 = vmatprep.mubr.msk.f32.mxu0 %vm168_vm0, %v110_v61  ;;  %2157 = vmatpush3.bf16.msra.mxu1 %v2657_v26 }
  0x85   :  { %v2599_v1 = vpop.permute.xlu0 %97  ;;  %v2602_v4 = vpop.permute.xlu1 %107  ;;  %2158 = vmatprep.subr.bf16.mxu1 %v2368_v54 }
  0x86   :  { %v111_v2 = vmul.f32 %v2599_v1, %v80_v34  ;;  %v113_v7 = vmul.f32 %v2602_v4, %v2526_v33  ;;  %v60_v34 = vld [vmem:[%s3054_s11 + $0x40] sm:$0xff] }
  0x87   :  { %v2677_v36 = vpack.c.bf16 %v61_v35, %v60_v34  ;;  %v2778_v35 = vld [vmem:[%s3056_s12] sm:$0xff] }
  0x88   :  { %1800 = vmatmul.mubr.msk.f32.vlgmr.msra.gmra.mrb[0].mxu0 %vm168_vm0, %v111_v2  ;;  %2160 = vmatpush3.bf16.msra.mxu1 %v2667_v31 }
  0x89   :  { %2136 = vmatpush3.bf16.msra.mxu0 %v2133_v52  ;;  %v2613_v8 = vpop.permute.xlu0 %129  ;;  %1802 = vmatprep.mubr.msk.f32.mxu0 %vm168_vm0, %v112_v0  ;;  %v2625_v14 = vpop.permute.xlu1 %134 }
  0x8a   :  { %v147_v9 = vmul.f32 %v2613_v8, %v117_v45  ;;  %2138 = vmatprep.subr.bf16.mxu0 %v2137_v3  ;;  %v148_v16 = vmul.f32 %v2625_v14, %v2540_v40  ;;  %2161 = vmatprep.subr.bf16.mxu1 %v2368_v54  ;;  %v64_v40 = vld [vmem:[%s3054_s11 + $0x60] sm:$0xff]  ;;  %v2707_v45 = vpack.c.bf16 %v67_v44, %v66_v43 }
  0x8b   :  { %v2697_v42 = vpack.c.bf16 %v65_v41, %v64_v40 }
  0x8c   :  { %1803 = vmatmul.mubr.msk.f32.gmra.mrb[2].mxu0 %vm168_vm0, %v113_v7  ;;  %2163 = vmatpush3.bf16.msra.mxu1 %v2677_v36 }
  0x8d   :  { %2140 = vmatpush3.bf16.msra.mxu0 %v2137_v3  ;;  %1821 = vmatprep.mubr.msk.f32.mxu0 %vm168_vm0, %v147_v9  ;;  %v2627_v15 = vpop.permute.xlu0 %139  ;;  %v2631_v17 = vpop.permute.xlu1 %144 }
  0x8e   :  { %2142 = vmatprep.subr.bf16.mxu0 %v2141_v10  ;;  %v149_v19 = vmul.f32 %v2627_v15, %v121_v49  ;;  %v150_v21 = vmul.f32 %v2631_v17, %v126_v18  ;;  %2164 = vmatprep.subr.bf16.mxu1 %v2368_v54 }
  0x90   :  { %2166 = vmatpush3.bf16.msra.mxu1 %v2687_v39 }
  0x91   :  { %2144 = vmatpush3.bf16.msra.mxu0 %v2141_v10  ;;  %2167 = vmatprep.subr.bf16.mxu1 %v2368_v54 }
  0x92   :  { %2146 = vmatprep.subr.bf16.mxu0 %v2145_v13 }
  0x94   :  { %2169 = vmatpush3.bf16.msra.mxu1 %v2697_v42 }
  0x95   :  { %2148 = vmatpush3.bf16.msra.mxu0 %v2145_v13  ;;  %2170 = vmatprep.subr.bf16.mxu1 %v2368_v54 }
  0x96   :  { %1897 = vmatprep.subr.mxu0 %v2370_v46 }
  0x98   :  { %1822 = vmatmul.mubr.msk.f32.vlgmr.msra.gmra.mrb[0].mxu0 %vm168_vm0, %v148_v16  ;;  %2172 = vmatpush3.bf16.msra.mxu1 %v2707_v45 }
  0x99   :  { %1824 = vmatprep.mubr.msk.f32.mxu0 %vm168_vm0, %v149_v19  ;;  %2173 = vmatprep.subr.bf16.mxu1 %v2368_v54 }
  0x9a   :  { %1898 = vmatpush3.msra.mxu0 %v2778_v35 }
  0x9b   :  { %1902 = vmatprep.subr.mxu0 %v2370_v46 }
  0x9c   :  { %1825 = vmatmul.mubr.msk.f32.gmra.mrb[2].mxu0 %vm168_vm0, %v150_v21 }
  0x9d   :  { %1899 = vmatprep.mubr.msk.f32.mxu0 %vm2369_vm3, %v2370_v46 }
  0xee   :  { %v1779_v27 = vpop.f32.mrb[0].mxu1 }
  0xef   :  { %v243_v28 = vpop.f32.mrb[1].mxu1 }
  0xf2   :  { %v1782_v32 = vpop.f32.mrb[2].mxu1 }
  0xf3   :  { %v253_v33 = vpop.f32.mrb[3].mxu1 }
 0x16b   :  { %v1823_v47 = vpop.f32.mrb[0].mxu0 }
 0x16c   :  { %v2341_v49 = vadd.f32 %v1823_v47, %v1779_v27  ;;  %v446_v50 = vpop.f32.mrb[1].mxu0 }
 0x16d   :  { %v2342_v51 = vadd.f32 %v446_v50, %v243_v28  ;;  %v470_v50 = vld [vmem:[%s3057_s5] sm:$0x1] }
 0x16e   :  { %v479_v52 = vadd.f32 %v2341_v49, %v1551_v48 }
 0x16f   :  { %v478_v53 = vadd.f32 %v2342_v51, %v1551_v48  ;;  %v1826_v55 = vpop.f32.mrb[2].mxu0  ;;  %v1554_v51 = vld [vmem:[%s3058_s7 + $0x80] sm:$0xff] }
 0x170   :  { %v2343_v56 = vadd.f32 %v1826_v55, %v1782_v32  ;;  %v456_v58 = vpop.f32.mrb[3].mxu0  ;;  %v2719_v61 = vmax.f32 %v479_v52, 0.0  ;;  %v1555_v52 = vld [vmem:[%s3058_s7 + $0x88] sm:$0xff] }
 0x171   :  { %v2721_v62 = vmax.f32 %v478_v53, 0.0  ;;  %v2344_v63 = vadd.f32 %v456_v58, %v253_v33  ;;  %v471_v58 = vld [vmem:[%s3059_s6] sm:$0x1] }
 0x172   :  { %v481_v0 = vadd.f32 %v2343_v56, %v1551_v48  ;;  %v496_v16 = vmul.f32 %v2719_v61, %v2719_v61  ;;  %v2197_v56 = vpack.c.bf16 %v1555_v52, %v1554_v51 }
 0x173   :  { %v480_v2 = vadd.f32 %v2344_v63, %v1551_v48  ;;  %v486_v3 = vadd.f32 %v2719_v61, %v2721_v62  ;;  %v495_v18 = vmul.f32 %v2721_v62, %v2721_v62  ;;  %v1556_v63 = vld [vmem:[%s3058_s7 + $0x90] sm:$0xff] }
 0x174   :  { %v2727_v6 = vmax.f32 %v481_v0, 0.0  ;;  %v1557_v0 = vld [vmem:[%s3058_s7 + $0x98] sm:$0xff] }
 0x175   :  { %v2725_v5 = vmax.f32 %v480_v2, 0.0  ;;  %v499_v20 = vadd.f32 %v496_v16, %v495_v18  ;;  %v1562_v18 = vld [vmem:[%s3058_s7 + $0xc0] sm:$0xff] }
 0x176   :  { %v498_v25 = vmul.f32 %v2727_v6, %v2727_v6 }
 0x177   :  { %v487_v7 = vadd.f32 %v486_v3, %v2725_v5  ;;  %v497_v21 = vmul.f32 %v2725_v5, %v2725_v5 }
 0x179   :  { %v488_v9 = vadd.f32 %v487_v7, %v2727_v6  ;;  %v500_v24 = vadd.f32 %v499_v20, %v497_v21  ;;  %v2201_v7 = vpack.c.bf16 %v1557_v0, %v1556_v63  ;;  %v1565_v20 = vld [vmem:[%s3058_s7 + $0xd8] sm:$0xff] }
 0x17b   :  { %v489_v10 = vrot.slane %v488_v9, 4  ;;  %v501_v27 = vadd.f32 %v500_v24, %v498_v25  ;;  %v1566_v25 = vld [vmem:[%s3058_s7 + $0xe0] sm:$0xff] }
 0x17d   :  { %v490_v11 = vadd.f32 %v489_v10, %v488_v9  ;;  %v502_v28 = vrot.slane %v501_v27, 4  ;;  %v1558_v9 = vld [vmem:[%s3058_s7 + $0xa0] sm:$0xff]  ;;  %v1559_v10 = vld [vmem:[%s3058_s7 + $0xa8] sm:$0xff] }
 0x17f   :  { %v491_v12 = vrot.slane %v490_v11, 2  ;;  %v503_v29 = vadd.f32 %v502_v28, %v501_v27  ;;  %v1567_v27 = vld [vmem:[%s3058_s7 + $0xe8] sm:$0xff] }
 0x180   :  { %v2221_v28 = vpack.c.bf16 %v1567_v27, %v1566_v25  ;;  %v862_v25 = vld [vmem:[%s3058_s7 + $0x30] sm:$0xff]  ;;  %v863_v27 = vld [vmem:[%s3058_s7 + $0x38] sm:$0xff] }
 0x181   :  { %v492_v13 = vadd.f32 %v491_v12, %v490_v11  ;;  %v504_v30 = vrot.slane %v503_v29, 2  ;;  %v2205_v11 = vpack.c.bf16 %v1559_v10, %v1558_v9  ;;  %v1560_v12 = vld [vmem:[%s3058_s7 + $0xb0] sm:$0xff]  ;;  %v860_v10 = vld [vmem:[%s3058_s7 + $0x20] sm:$0xff] }
 0x183   :  { %v493_v19 = vrot.slane %v492_v13, 1  ;;  %v505_v32 = vadd.f32 %v504_v30, %v503_v29  ;;  %v1568_v29 = vld [vmem:[%s3058_s7 + $0xf0] sm:$0xff]  ;;  %v1569_v30 = vld [vmem:[%s3058_s7 + $0xf8] sm:$0xff] }
 0x185   :  { %v494_v22 = vadd.f32 %v493_v19, %v492_v13  ;;  %v506_v33 = vrot.slane %v505_v32, 1  ;;  %v1561_v13 = vld [vmem:[%s3058_s7 + $0xb8] sm:$0xff]  ;;  %v1563_v19 = vld [vmem:[%s3058_s7 + $0xc8] sm:$0xff] }
 0x186   :  { %v2209_v16 = vpack.c.bf16 %v1561_v13, %v1560_v12  ;;  %v2213_v21 = vpack.c.bf16 %v1563_v19, %v1562_v18 }
 0x187   :  { %1860 = vmatmul.mubr.f32.vlgmr.msra.gmra.mrb[4].mxu1 %v494_v22  ;;  %v507_v34 = vadd.f32 %v506_v33, %v505_v32  ;;  %v1564_v22 = vld [vmem:[%s3058_s7 + $0xd0] sm:$0xff]  ;;  %v2225_v32 = vpack.c.bf16 %v1569_v30, %v1568_v29  ;;  %v856_v33 = vld [vmem:[%s3058_s7] sm:$0xff] }
 0x188   :  { %2175 = vmatpush3.bf16.msra.mxu1 %v2576_v57  ;;  %1894 = vmatprep.mubr.msk.f32.mxu1 %vm2369_vm3, %v2370_v46  ;;  %v2217_v24 = vpack.c.bf16 %v1565_v20, %v1564_v22 }
 0x189   :  { %2176 = vmatprep.subr.bf16.mxu1 %v2368_v54 }
 0x18c   :  { %2178 = vmatpush3.bf16.msra.mxu1 %v2647_v23 }
 0x18d   :  { %2179 = vmatprep.subr.bf16.mxu1 %v2368_v54 }
 0x190   :  { %2181 = vmatpush3.bf16.msra.mxu1 %v2657_v26 }
 0x191   :  { %2182 = vmatprep.subr.bf16.mxu1 %v2368_v54 }
 0x194   :  { %2184 = vmatpush3.bf16.msra.mxu1 %v2667_v31 }
 0x195   :  { %2185 = vmatprep.subr.bf16.mxu1 %v2368_v54 }
 0x198   :  { %2187 = vmatpush3.bf16.msra.mxu1 %v2677_v36 }
 0x199   :  { %2188 = vmatprep.subr.bf16.mxu1 %v2368_v54 }
 0x19c   :  { %2190 = vmatpush3.bf16.msra.mxu1 %v2687_v39 }
 0x19d   :  { %2191 = vmatprep.subr.bf16.mxu1 %v2368_v54 }
 0x1a0   :  { %2193 = vmatpush3.bf16.msra.mxu1 %v2697_v42 }
 0x1a1   :  { %2194 = vmatprep.subr.bf16.mxu1 %v2368_v54 }
 0x1a4   :  { %2196 = vmatpush3.bf16.msra.mxu1 %v2707_v45 }
 0x1a5   :  { %2293 = vmatprep.subr.bf16.mxu1 %v2368_v54 }
 0x1a7   :  { %1895 = vmatmul.mubr.f32.vlgmr.msra.gmra.mrb[6].mxu1 %v507_v34  ;;  %v857_v34 = vld [vmem:[%s3058_s7 + $0x8] sm:$0xff] }
 0x1a8   :  { %2295 = vmatpush3.bf16.msra.mxu1 %v2576_v57  ;;  %2053 = vmatprep.mubr.msk.f32.mxu1 %vm2369_vm3, %v2370_v46 }
 0x1a9   :  { %2296 = vmatprep.subr.bf16.mxu1 %v2368_v54 }
 0x1ac   :  { %2298 = vmatpush3.bf16.msra.mxu1 %v2647_v23 }
 0x1ad   :  { %2299 = vmatprep.subr.bf16.mxu1 %v2368_v54 }
 0x1b0   :  { %2301 = vmatpush3.bf16.msra.mxu1 %v2657_v26 }
 0x1b1   :  { %2302 = vmatprep.subr.bf16.mxu1 %v2368_v54 }
 0x1b4   :  { %2304 = vmatpush3.bf16.msra.mxu1 %v2667_v31 }
 0x1b5   :  { %2305 = vmatprep.subr.bf16.mxu1 %v2368_v54 }
 0x1b8   :  { %2307 = vmatpush3.bf16.msra.mxu1 %v2677_v36 }
 0x1b9   :  { %2308 = vmatprep.subr.bf16.mxu1 %v2368_v54 }
 0x1bc   :  { %2310 = vmatpush3.bf16.msra.mxu1 %v2687_v39 }
 0x1bd   :  { %2311 = vmatprep.subr.bf16.mxu1 %v2368_v54 }
 0x1c0   :  { %2313 = vmatpush3.bf16.msra.mxu1 %v2697_v42 }
 0x1c1   :  { %2314 = vmatprep.subr.bf16.mxu1 %v2368_v54 }
 0x1c4   :  { %2316 = vmatpush3.bf16.msra.mxu1 %v2707_v45 }
 0x1c5   :  { %2317 = vmatprep.subr.bf16.mxu1 %v2368_v54 }
 0x25a   :  { %v574_v37 = vpop.f32.mrb[4].mxu1 }
 0x25b   :  { %v1861_v38 = vpop.f32.mrb[5].mxu1  ;;  %v578_v40 = vmul.f32 0.001953125, %v574_v37  ;;  %v2229_v37 = vpack.c.bf16 %v857_v34, %v856_v33  ;;  %v865_v33 = vld [vmem:[%s3058_s7 + $0x48] sm:$0xff] }
 0x25c   :  { %v804_v38 = vlaneseq }
 0x25d   :  { %v650_v43 = vmul.f32 %v578_v40, %v578_v40 }
 0x27a   :  { %v645_v41 = vpop.f32.mrb[6].mxu1 }
 0x27b   :  { %v649_v44 = vmul.f32 0.001953125, %v645_v41  ;;  %v1896_v47 = vpop.f32.mrb[7].mxu1 }
 0x27d   :  { %v651_v48 = vsub.f32 %v649_v44, %v650_v43 }
 0x27f   :  { %v652_v49 = vadd.f32 1e-05, %v651_v48 }
 0x281   :  { %2363 = vrsqrt.f32 %v652_v49 }
 0x28b   :  { %v2364_v53 = vpop.eup %2363 }
 0x28c   :  { %v654_v55 = vmul.f32 %v2364_v53, %v470_v50 }
 0x28e   :  { %1900 = vmatmul.mubr.msk.f32.vlgmr.msra.gmra.mrb[4].mxu0 %vm657_vm4, %v654_v55  ;;  %v655_v2 = vmul.f32 %v654_v55, %v578_v40  ;;  %v805_v40 = vshrl.u32 %v804_v38, 7  ;;  %v858_v55 = vld [vmem:[%s3058_s7 + $0x10] sm:$0xff]  ;;  %v867_v38 = vld [vmem:[%s3058_s7 + $0x58] sm:$0xff] }
 0x28f   :  { %1903 = vmatpush3.msra.mxu0 %v2778_v35  ;;  %1904 = vmatprep.mubr.msk.f32.mxu0 %vm2369_vm3, %v2370_v46 }
 0x290   :  { %v656_v3 = vsub.f32 %v471_v58, %v655_v2  ;;  %2198 = vmatprep.subr.bf16.mxu0 %v2197_v56  ;;  %v2847_v41 = vsub.s32 0, %v805_v40 }
 0x292   :  { %1905 = vmatmul.mubr.msk.f32.vlgmr.msra.gmra.mrb[6].mxu0 %vm657_vm4, %v656_v3 }
 0x293   :  { %2200 = vmatpush3.bf16.msra.mxu0 %v2197_v56  ;;  %v859_v56 = vld [vmem:[%s3058_s7 + $0x18] sm:$0xff] }
 0x294   :  { %2202 = vmatprep.subr.bf16.mxu0 %v2201_v7  ;;  %v2233_v3 = vpack.c.bf16 %v859_v56, %v858_v55  ;;  %v1572_v55 = vld [vmem:[%s3058_s7 + $0x110] sm:$0xff]  ;;  %v1573_v56 = vld [vmem:[%s3058_s7 + $0x118] sm:$0xff] }
 0x297   :  { %2204 = vmatpush3.bf16.msra.mxu0 %v2201_v7 }
 0x298   :  { %2206 = vmatprep.subr.bf16.mxu0 %v2205_v11 }
 0x29b   :  { %2208 = vmatpush3.bf16.msra.mxu0 %v2205_v11  ;;  %v861_v11 = vld [vmem:[%s3058_s7 + $0x28] sm:$0xff] }
 0x29c   :  { %2210 = vmatprep.subr.bf16.mxu0 %v2209_v16  ;;  %v2237_v22 = vpack.c.bf16 %v861_v11, %v860_v10  ;;  %v1580_v11 = vld [vmem:[%s3058_s7 + $0x150] sm:$0xff] }
 0x29f   :  { %2212 = vmatpush3.bf16.msra.mxu0 %v2209_v16 }
 0x2a0   :  { %2214 = vmatprep.subr.bf16.mxu0 %v2213_v21 }
 0x2a3   :  { %2216 = vmatpush3.bf16.msra.mxu0 %v2213_v21 }
 0x2a4   :  { %2218 = vmatprep.subr.bf16.mxu0 %v2217_v24 }
 0x2a7   :  { %2220 = vmatpush3.bf16.msra.mxu0 %v2217_v24 }
 0x2a8   :  { %2222 = vmatprep.subr.bf16.mxu0 %v2221_v28 }
 0x2ab   :  { %2224 = vmatpush3.bf16.msra.mxu0 %v2221_v28 }
 0x2ac   :  { %2226 = vmatprep.subr.bf16.mxu0 %v2225_v32 }
 0x2af   :  { %2228 = vmatpush3.bf16.msra.mxu0 %v2225_v32  ;;  %v864_v32 = vld [vmem:[%s3058_s7 + $0x40] sm:$0xff] }
 0x2b0   :  { %2230 = vmatprep.subr.bf16.mxu0 %v2229_v37  ;;  %v2245_v34 = vpack.c.bf16 %v865_v33, %v864_v32 }
 0x361   :  { %v727_v43 = vpop.f32.mrb[4].mxu0 }
 0x362   :  { %v807_v44 = vrot.slane %v727_v43, %v2847_v41  ;;  %v1901_v47 = vpop.f32.mrb[5].mxu0  ;;  %v868_v43 = vld [vmem:[%s3058_s7 + $0x60] sm:$0xff] }
 0x364   :  { %v809_v48 = vmul.f32 %v807_v44, %v2719_v61  ;;  %v808_v52 = vmul.f32 %v807_v44, %v2721_v62  ;;  %v810_v53 = vmul.f32 %v807_v44, %v2725_v5  ;;  %v811_v58 = vmul.f32 %v807_v44, %v2727_v6  ;;  %v869_v44 = vld [vmem:[%s3058_s7 + $0x68] sm:$0xff] }
 0x365   :  { %v800_v49 = vpop.f32.mrb[6].mxu0  ;;  %v2253_v47 = vpack.c.bf16 %v869_v44, %v868_v43 }
 0x366   :  { %v815_v50 = vrot.slane %v800_v49, %v2847_v41  ;;  %v1906_v51 = vpop.f32.mrb[7].mxu0  ;;  %v871_v49 = vld [vmem:[%s3058_s7 + $0x78] sm:$0xff] }
 0x367   :  { %v1570_v51 = vld [vmem:[%s3058_s7 + $0x100] sm:$0xff] }
 0x368   :  { %v816_v63 = vadd.f32 %v815_v50, %v808_v52  ;;  %v817_v61 = vadd.f32 %v815_v50, %v809_v48  ;;  %v818_v0 = vadd.f32 %v815_v50, %v810_v53  ;;  %v2861_v2 = vadd.f32 %v815_v50, %v811_v58  ;;  %v870_v48 = vld [vmem:[%s3058_s7 + $0x70] sm:$0xff]  ;;  %v1571_v52 = vld [vmem:[%s3058_s7 + $0x108] sm:$0xff] }
 0x369   :  { %v2257_v50 = vpack.c.bf16 %v871_v49, %v870_v48  ;;  %v2261_v53 = vpack.c.bf16 %v1571_v52, %v1570_v51 }
 0x36a   :  { %v840_v7 = vrot.slane %v816_v63, 1  ;;  %1939 = vmatprep.mubr.f32.mxu0 %v816_v63  ;;  %v825_v62 = vrot.slane %v817_v61, 7  ;;  %v827_v5 = vrot.slane %v818_v0, 7  ;;  %v843_v9 = vrot.slane %v818_v0, 1 }
 0x36b   :  { %1940 = vmatmul.mubr.f32.vlgmr.msra.gmra.mrb[8].mxu0 %v817_v61  ;;  %v829_v6 = vrot.slane %v2861_v2, 7  ;;  %v845_v12 = vrot.slane %v2861_v2, 1  ;;  %v824_v13 = vrot.slane %v816_v63, 7  ;;  %v841_v16 = vrot.slane %v817_v61, 1 }
 0x36c   :  { %2232 = vmatpush3.bf16.msra.mxu0 %v2229_v37  ;;  %1942 = vmatprep.mubr.f32.mxu0 %v818_v0  ;;  %v828_v18 = vsel %vm77_vm1, %v825_v62, %v827_v5  ;;  %v866_v37 = vld [vmem:[%s3058_s7 + $0x50] sm:$0xff]  ;;  %v2265_v63 = vpack.c.bf16 %v1573_v56, %v1572_v55  ;;  %v1574_v0 = vld [vmem:[%s3058_s7 + $0x120] sm:$0xff] }
 0x36d   :  { %2234 = vmatprep.subr.bf16.mxu0 %v2233_v3  ;;  %v826_v19 = vsel %vm77_vm1, %v824_v13, %v825_v62  ;;  %v835_v21 = vsel %vm77_vm1, 0.0, %v824_v13  ;;  %v830_v20 = vsel %vm77_vm1, %v827_v5, %v829_v6  ;;  %v842_v28 = vsel %vm114_vm2, %v840_v7, %v841_v16  ;;  %v1577_v5 = vld [vmem:[%s3058_s7 + $0x138] sm:$0xff] }
 0x36e   :  { %v836_v24 = vmul.f32 %v835_v21, %v2587_v60  ;;  %v2885_v29 = vsel %vm114_vm2, %v841_v16, %v843_v9  ;;  %v2890_v30 = vsel %vm114_vm2, %v843_v9, %v845_v12  ;;  %v2241_v60 = vpack.c.bf16 %v863_v27, %v862_v25  ;;  %v1581_v6 = vld [vmem:[%s3058_s7 + $0x158] sm:$0xff]  ;;  %v1582_v16 = vld [vmem:[%s3058_s7 + $0x160] sm:$0xff]  ;;  %v1584_v21 = vld [vmem:[%s3058_s7 + $0x170] sm:$0xff] }
 0x36f   :  { %1943 = vmatmul.mubr.f32.gmra.mrb[10].mxu0 %v2861_v2  ;;  %v2249_v40 = vpack.c.bf16 %v867_v38, %v866_v37  ;;  %v837_v58 = vmul.f32 %v826_v19, %v2599_v1  ;;  %v838_v61 = vmul.f32 %v828_v18, %v2585_v59  ;;  %v839_v7 = vmul.f32 %v830_v20, %v2602_v4  ;;  %v1576_v59 = vld [vmem:[%s3058_s7 + $0x130] sm:$0xff]  ;;  %v1578_v4 = vld [vmem:[%s3058_s7 + $0x140] sm:$0xff]  ;;  %v1583_v18 = vld [vmem:[%s3058_s7 + $0x168] sm:$0xff] }
 0x370   :  { %2236 = vmatpush3.bf16.msra.mxu0 %v2233_v3  ;;  %1977 = vmatprep.mubr.f32.mxu0 %v836_v24  ;;  %v1575_v3 = vld [vmem:[%s3058_s7 + $0x128] sm:$0xff]  ;;  %v852_v1 = vmul.f32 %v842_v28, %v2613_v8  ;;  %v2273_v9 = vpack.c.bf16 %v1577_v5, %v1576_v59  ;;  %v2281_v13 = vpack.c.bf16 %v1581_v6, %v1580_v11  ;;  %v851_v27 = vsel %vm114_vm2, %v845_v12, 0.0 }
 0x371   :  { %2238 = vmatprep.subr.bf16.mxu0 %v2237_v22  ;;  %v2269_v62 = vpack.c.bf16 %v1575_v3, %v1574_v0  ;;  %v1579_v8 = vld [vmem:[%s3058_s7 + $0x148] sm:$0xff]  ;;  %v2285_v19 = vpack.c.bf16 %v1583_v18, %v1582_v16  ;;  %v853_v24 = vmul.f32 %v2885_v29, %v2625_v14  ;;  %v854_v25 = vmul.f32 %v2890_v30, %v2627_v15  ;;  %v1586_v14 = vld [vmem:[%s3060_s8] ss:$0 sm:$0xff] }
 0x372   :  { %v2277_v10 = vpack.c.bf16 %v1579_v8, %v1578_v4  ;;  %v855_v28 = vmul.f32 %v851_v27, %v2631_v17 }
 0x374   :  { %2240 = vmatpush3.bf16.msra.mxu0 %v2237_v22  ;;  %v1585_v22 = vld [vmem:[%s3058_s7 + $0x178] sm:$0xff] }
 0x375   :  { %2242 = vmatprep.subr.bf16.mxu0 %v2241_v60  ;;  %v2289_v20 = vpack.c.bf16 %v1585_v22, %v1584_v21 }
 0x378   :  { %2244 = vmatpush3.bf16.msra.mxu0 %v2241_v60 }
 0x379   :  { %2246 = vmatprep.subr.bf16.mxu0 %v2245_v34 }
 0x37c   :  { %2248 = vmatpush3.bf16.msra.mxu0 %v2245_v34 }
 0x37d   :  { %2250 = vmatprep.subr.bf16.mxu0 %v2249_v40 }
 0x380   :  { %2252 = vmatpush3.bf16.msra.mxu0 %v2249_v40 }
 0x381   :  { %2254 = vmatprep.subr.bf16.mxu0 %v2253_v47 }
 0x384   :  { %2256 = vmatpush3.bf16.msra.mxu0 %v2253_v47 }
 0x385   :  { %2258 = vmatprep.subr.bf16.mxu0 %v2257_v50 }
 0x388   :  { %2260 = vmatpush3.bf16.msra.mxu0 %v2257_v50 }
 0x389   :  { %2262 = vmatprep.subr.bf16.mxu0 %v2261_v53 }
 0x38b   :  { %1978 = vmatmul.mubr.f32.vlgmr.msra.gmra.mrb[8].mxu0 %v837_v58 }
 0x38c   :  { %1980 = vmatprep.mubr.f32.mxu0 %v838_v61  ;;  %2264 = vmatpush3.bf16.msra.mxu0 %v2261_v53 }
 0x38d   :  { %2266 = vmatprep.subr.bf16.mxu0 %v2265_v63 }
 0x38f   :  { %1981 = vmatmul.mubr.f32.gmra.mrb[10].mxu0 %v839_v7 }
 0x390   :  { %2268 = vmatpush3.bf16.msra.mxu0 %v2265_v63  ;;  %2015 = vmatprep.mubr.f32.mxu0 %v852_v1 }
 0x391   :  { %2270 = vmatprep.subr.bf16.mxu0 %v2269_v62 }
 0x394   :  { %2272 = vmatpush3.bf16.msra.mxu0 %v2269_v62 }
 0x395   :  { %2274 = vmatprep.subr.bf16.mxu0 %v2273_v9 }
 0x398   :  { %2276 = vmatpush3.bf16.msra.mxu0 %v2273_v9 }
 0x399   :  { %2278 = vmatprep.subr.bf16.mxu0 %v2277_v10 }
 0x39c   :  { %2280 = vmatpush3.bf16.msra.mxu0 %v2277_v10 }
 0x39d   :  { %2282 = vmatprep.subr.bf16.mxu0 %v2281_v13 }
 0x3a0   :  { %2284 = vmatpush3.bf16.msra.mxu0 %v2281_v13 }
 0x3a1   :  { %2286 = vmatprep.subr.bf16.mxu0 %v2285_v19 }
 0x3a4   :  { %2288 = vmatpush3.bf16.msra.mxu0 %v2285_v19 }
 0x3a5   :  { %2290 = vmatprep.subr.bf16.mxu0 %v2289_v20 }
 0x3a8   :  { %2292 = vmatpush3.bf16.msra.mxu0 %v2289_v20 }
 0x3a9   :  { %2091 = vmatprep.subr.mxu0 %v2370_v46 }
 0x3ab   :  { %2016 = vmatmul.mubr.f32.vlgmr.msra.gmra.mrb[8].mxu0 %v853_v24 }
 0x3ac   :  { %2018 = vmatprep.mubr.f32.mxu0 %v854_v25  ;;  %2092 = vmatpush3.msra.mxu0 %v2778_v35 }
 0x3af   :  { %2019 = vmatmul.mubr.f32.gmra.mrb[10].mxu0 %v855_v28 }
 0x3b0   :  { %2093 = vmatprep.mubr.msk.f32.mxu0 %vm2369_vm3, %v2370_v46 }
 0x47e   :  { %v2017_v29 = vpop.f32.mrb[8].mxu0 }
 0x47f   :  { %v1175_v15 = vadd.f32 %v2017_v29, %v1586_v14  ;;  %v1142_v30 = vpop.f32.mrb[9].mxu0 }
 0x480   :  { %v1174_v2 = vadd.f32 %v1586_v14, %v1142_v30 }
 0x481   :  { %v2983_v60 = vmax.f32 %v1175_v15, 0.0 }
 0x482   :  { %v2985_v12 = vmax.f32 %v1174_v2, 0.0  ;;  %v2020_v32 = vpop.f32.mrb[10].mxu0 }
 0x483   :  { %v1152_v33 = vpop.f32.mrb[11].mxu0  ;;  %v1177_v34 = vadd.f32 %v2020_v32, %v1586_v14  ;;  %v1192_v51 = vmul.f32 %v2983_v60, %v2983_v60 }
 0x484   :  { %v1176_v17 = vadd.f32 %v1586_v14, %v1152_v33  ;;  %v1182_v37 = vadd.f32 %v2983_v60, %v2985_v12  ;;  %v1191_v52 = vmul.f32 %v2985_v12, %v2985_v12 }
 0x485   :  { %v2991_v40 = vmax.f32 %v1177_v34, 0.0 }
 0x486   :  { %v2989_v38 = vmax.f32 %v1176_v17, 0.0  ;;  %v1195_v58 = vadd.f32 %v1192_v51, %v1191_v52 }
 0x487   :  { %v1194_v61 = vmul.f32 %v2991_v40, %v2991_v40 }
 0x488   :  { %v1183_v43 = vadd.f32 %v1182_v37, %v2989_v38  ;;  %v1193_v55 = vmul.f32 %v2989_v38, %v2989_v38 }
 0x48a   :  { %v1184_v44 = vadd.f32 %v1183_v43, %v2991_v40  ;;  %v1196_v63 = vadd.f32 %v1195_v58, %v1193_v55 }
 0x48c   :  { %v1185_v47 = vrot.slane %v1184_v44, 4  ;;  %v1197_v0 = vadd.f32 %v1196_v63, %v1194_v61 }
 0x48e   :  { %v1186_v48 = vadd.f32 %v1185_v47, %v1184_v44  ;;  %v1198_v3 = vrot.slane %v1197_v0, 4 }
 0x490   :  { %v1187_v49 = vrot.slane %v1186_v48, 2 }
 0x492   :  { %v1188_v50 = vadd.f32 %v1187_v49, %v1186_v48 }
 0x494   :  { %v1189_v53 = vrot.slane %v1188_v50, 1 }
 0x496   :  { %v1190_v56 = vadd.f32 %v1189_v53, %v1188_v50 }
 0x498   :  { %2054 = vmatmul.mubr.f32.vlgmr.msra.gmra.mrb[8].mxu1 %v1190_v56 }
 0x499   :  { %2319 = vmatpush3.bf16.msra.mxu1 %v2576_v57  ;;  %2088 = vmatprep.mubr.msk.f32.mxu1 %vm2369_vm3, %v2370_v46  ;;  %v1199_v57 = vadd.f32 %v1198_v3, %v1197_v0 }
 0x49a   :  { %2320 = vmatprep.subr.bf16.mxu1 %v2368_v54 }
 0x49b   :  { %v1200_v7 = vrot.slane %v1199_v57, 2 }
 0x49d   :  { %2322 = vmatpush3.bf16.msra.mxu1 %v2647_v23  ;;  %v1201_v23 = vadd.f32 %v1200_v7, %v1199_v57 }
 0x49e   :  { %2323 = vmatprep.subr.bf16.mxu1 %v2368_v54 }
 0x4a1   :  { %2325 = vmatpush3.bf16.msra.mxu1 %v2657_v26  ;;  %v1202_v26 = vrot.slane %v1201_v23, 1 }
 0x4a2   :  { %2326 = vmatprep.subr.bf16.mxu1 %v2368_v54 }
 0x4a5   :  { %2328 = vmatpush3.bf16.msra.mxu1 %v2667_v31  ;;  %v1203_v31 = vadd.f32 %v1202_v26, %v1201_v23 }
 0x4a6   :  { %2329 = vmatprep.subr.bf16.mxu1 %v2368_v54 }
 0x4a9   :  { %2331 = vmatpush3.bf16.msra.mxu1 %v2677_v36 }
 0x4aa   :  { %2332 = vmatprep.subr.bf16.mxu1 %v2368_v54 }
 0x4ad   :  { %2334 = vmatpush3.bf16.msra.mxu1 %v2687_v39 }
 0x4ae   :  { %2335 = vmatprep.subr.bf16.mxu1 %v2368_v54 }
 0x4b1   :  { %2337 = vmatpush3.bf16.msra.mxu1 %v2697_v42 }
 0x4b2   :  { %2338 = vmatprep.subr.bf16.mxu1 %v2368_v54 }
 0x4b5   :  { %2340 = vmatpush3.bf16.msra.mxu1 %v2707_v45  ;;  %v1166_v45 = vld [vmem:[%s3061_s9] sm:$0x1] }
 0x4b6   :  { %2096 = vmatprep.subr.mxu1 %v2370_v46 }
 0x4b8   :  { %2089 = vmatmul.mubr.f32.vlgmr.msra.gmra.mrb[10].mxu1 %v1203_v31 }
 0x4b9   :  { %2097 = vmatpush3.msra.mxu1 %v2778_v35  ;;  %2098 = vmatprep.mubr.msk.f32.mxu1 %vm2369_vm3, %v2370_v46  ;;  %v1167_v46 = vld [vmem:[%s3062_s10] sm:$0x1] }
 0x56b   :  { %v1270_v36 = vpop.f32.mrb[8].mxu1 }
 0x56c   :  { %v2055_v39 = vpop.f32.mrb[9].mxu1  ;;  %v1274_v62 = vmul.f32 0.001953125, %v1270_v36 }
 0x56e   :  { %v1346_v59 = vmul.f32 %v1274_v62, %v1274_v62 }
 0x58b   :  { %v1341_v1 = vpop.f32.mrb[10].mxu1 }
 0x58c   :  { %v1345_v42 = vmul.f32 0.001953125, %v1341_v1  ;;  %v2090_v5 = vpop.f32.mrb[11].mxu1 }
 0x58e   :  { %v1347_v54 = vsub.f32 %v1345_v42, %v1346_v59 }
 0x590   :  { %v1348_v9 = vadd.f32 1e-05, %v1347_v54 }
 0x592   :  { %2365 = vrsqrt.f32 %v1348_v9 }
 0x59c   :  { %v2366_v4 = vpop.eup %2365 }
 0x59d   :  { %v1350_v8 = vmul.f32 %v2366_v4, %v1166_v45 }
 0x59f   :  { %2094 = vmatmul.mubr.msk.f32.vlgmr.msra.gmra.mrb[12].mxu0 %vm657_vm4, %v1350_v8  ;;  %v1351_v35 = vmul.f32 %v1350_v8, %v1274_v62 }
 0x5a1   :  { %v1352_v10 = vsub.f32 %v1167_v46, %v1351_v35 }
 0x5a3   :  { %2099 = vmatmul.mubr.msk.f32.vlgmr.msra.gmra.mrb[12].mxu1 %vm657_vm4, %v1352_v10 }
 0x672   :  { %v1422_v11 = vpop.f32.mrb[12].mxu0 }
 0x673   :  { %v1502_v6 = vrot.slane %v1422_v11, %v2847_v41  ;;  %v2095_v13 = vpop.f32.mrb[13].mxu0 }
 0x675   :  { %v1503_v16 = vmul.f32 %v1502_v6, %v2985_v12  ;;  %v1504_v19 = vmul.f32 %v1502_v6, %v2983_v60  ;;  %v1505_v21 = vmul.f32 %v1502_v6, %v2989_v38  ;;  %v1506_v22 = vmul.f32 %v1502_v6, %v2991_v40 }
 0x676   :  { %v1495_v18 = vpop.f32.mrb[12].mxu1 }
 0x677   :  { %v1510_v20 = vrot.slane %v1495_v18, %v2847_v41  ;;  %v2100_v24 = vpop.f32.mrb[13].mxu1 }
 0x679   :  { %v1511_v25 = vadd.f32 %v1510_v20, %v1503_v16  ;;  %v1512_v27 = vadd.f32 %v1510_v20, %v1504_v19  ;;  %v1513_v28 = vadd.f32 %v1510_v20, %v1505_v21  ;;  %v1514_v14 = vadd.f32 %v1510_v20, %v1506_v22 }
 0x67b   :  { %1515 = vst [vmem:[%s3063_s13] sm:$0xff] %v1511_v25  ;;  %1516 = vst [vmem:[%s3063_s13 + $0x8] sm:$0xff] %v1512_v27 }
 0x67c   :  { %1517 = vst [vmem:[%s3063_s13 + $0x10] sm:$0xff] %v1513_v28  ;;  %1518 = vst [vmem:[%s3063_s13 + $0x18] sm:$0xff] %v1514_v14 }

</bundles_post_ra>
